<compile_context>
chip_gen: v7x
topology: tpu7x:2x2x1
jax: 0.10.0
libtpu: 0.0.40
codegen_flags: <defaults>
</compile_context>

<pallas_src>
import jax
import jax.numpy as jnp
from jax.experimental import pallas as pl
from jax.experimental.pallas import tpu as pltpu

LANE = 128
_SINGLE_BUFFER_WEIGHTS = True  # apply pl.Buffered(1) to constant-index blocks


def _round_up(x, m):
    return ((x + m - 1) // m) * m


# ----------------------------- kernels -----------------------------

def _mlp3_kernel(x_ref, w1_ref, b1_ref, w2_ref, b2_ref, w34_ref, b34_ref, o_ref):
    # Three MXU matmuls with f32 accumulation; biases stay f32 and are added to the
    # f32 accumulator.  Intermediates are cast back to the weight dtype (no-op for f32).
    h = jnp.dot(x_ref[...], w1_ref[...],
                preferred_element_type=jnp.float32) + b1_ref[...]
    h = h.astype(w2_ref.dtype)
    h = jnp.dot(h, w2_ref[...],
                preferred_element_type=jnp.float32) + b2_ref[...]
    h = h.astype(w34_ref.dtype)
    out = jnp.dot(h, w34_ref[...],
                  preferred_element_type=jnp.float32) + b34_ref[...]
    o_ref[...] = out.astype(o_ref.dtype)


def _affine_kernel(x_ref, w_ref, b_ref, o_ref):
    out = jnp.dot(x_ref[...], w_ref[...],
                  preferred_element_type=jnp.float32) + b_ref[...]
    o_ref[...] = out.astype(o_ref.dtype)


# ----------------------------- specs / budgets -----------------------------

def _resident_spec(shape):
    """Whole-array block, same block every grid step (weights resident in VMEM)."""
    kwargs = {}
    if _SINGLE_BUFFER_WEIGHTS and hasattr(pl, "Buffered"):
        kwargs["pipeline_mode"] = pl.Buffered(1)   # constant block -> single buffer
    return pl.BlockSpec(shape, lambda i: (0, 0), **kwargs)


def _vmem_budget(resident_bytes, per_step_in_bytes, per_step_out_bytes, scratch_bytes):
    buf = 1 if (_SINGLE_BUFFER_WEIGHTS and hasattr(pl, "Buffered")) else 2
    est = (resident_bytes * buf
           + 2 * (per_step_in_bytes + per_step_out_bytes)   # double-buffered I/O tiles
           + 2 * scratch_bytes                               # f32 intermediates headroom
           + (4 << 20))                                      # compiler scratch margin
    # never below the common 32 MiB scoped default, never above v7x's 64 MiB physical
    return int(min(max(est, 32 << 20), 64 << 20))


# ----------------------------- parameter prep -----------------------------

def prepare_encoder_params(params, *, compute_dtype=jnp.bfloat16, fold=False):
    """One-time preparation (cache this at parameter-load time).

    Pads the last layer to a lane-dense width (multiple of 128), casts weights to the
    compute dtype (biases stay f32), and either pre-folds layers 3+4 (default) or the
    whole network into a single affine map (fold=True) -- both exact, since the torch
    module has no activations between layers."""
    w1, b1 = params["w1"], params["b1"]
    w2, b2 = params["w2"], params["b2"]
    w3, b3 = params["w3"], params["b3"]
    w4, b4 = params["w4"], params["b4"]
    x_dim = w1.shape[0]
    z_dim = w4.shape[1]
    z_pad = _round_up(z_dim, LANE)
    if z_pad != z_dim:
        w4 = jnp.pad(w4, ((0, 0), (0, z_pad - z_dim)))
        b4 = jnp.pad(b4, ((0, 0), (0, z_pad - z_dim)))
    cd = compute_dtype if compute_dtype is not None else w1.dtype

    if fold:
        w = ((w1 @ w2) @ w3) @ w4                               # [x_dim, z_pad]
        b = (((b1 @ w2) + b2) @ w3 + b3) @ w4 + b4              # [1, z_pad]
        return {"mode": "fold", "x_dim": x_dim, "z_dim": z_dim, "z_pad": z_pad,
                "w": w.astype(cd), "b": b.astype(jnp.float32)}

    w34 = w3 @ w4                                               # [512, z_pad]
    b34 = b3 @ w4 + b4                                          # [1, z_pad]
    return {"mode": "mlp3", "x_dim": x_dim, "z_dim": z_dim, "z_pad": z_pad,
            "w1": w1.astype(cd), "b1": b1.astype(jnp.float32),
            "w2": w2.astype(cd), "b2": b2.astype(jnp.float32),
            "w34": w34.astype(cd), "b34": b34.astype(jnp.float32)}


# ----------------------------- forward -----------------------------

def encoder_forward(x, params, *, tm=512, compute_dtype=jnp.bfloat16, fold=False,
                    vmem_limit_bytes=None):
    """Encoder forward pass.

    x:      [B, x_dim] array.
    params: raw params (w1..w4 as [in,out], b1..b4 as [1,out]) or an already-prepared
            dict from prepare_encoder_params (recommended: prepare once and reuse).
    """
    if "mode" not in params:
        params = prepare_encoder_params(params, compute_dtype=compute_dtype, fold=fold)

    B, x_dim = x.shape
    assert x_dim == params["x_dim"], "x feature dim does not match encoder params"
    z_dim, z_pad = params["z_dim"], params["z_pad"]
    out_dtype = x.dtype
    cd = (params["w"] if params["mode"] == "fold" else params["w1"]).dtype

    # bf16 packs two rows per sublane -> tiles must be multiples of 16 rows.
    row_align = 16 if (jnp.dtype(cd).itemsize < 4
                       or jnp.dtype(out_dtype).itemsize < 4) else 8

    # Batch tile: multiple of row_align, capped by the requested tm, and split so the
    # grid has >=2 steps whenever the batch allows (lets "parallel" use both v7x TCs).
    tm_req = max(row_align, (min(tm, _round_up(B, row_align)) // row_align) * row_align)
    if B > row_align:
        tm_eff = min(tm_req, _round_up(-(-B // 2), row_align))
    else:
        tm_eff = tm_req

    x_in = x.astype(cd)
    if B < tm_eff:                      # tiny batch: pad up to one full tile (cheap)
        x_in = jnp.pad(x_in, ((0, tm_eff - B), (0, 0)))
        b_rows = tm_eff
    else:                               # large batch: ragged last tile, no HBM pad copy
        b_rows = B
    grid = (pl.cdiv(b_rows, tm_eff),)

    x_spec = pl.BlockSpec((tm_eff, x_dim), lambda i: (i, 0))
    out_spec = pl.BlockSpec((tm_eff, z_pad), lambda i: (i, 0))
    out_shape = jax.ShapeDtypeStruct((b_rows, z_pad), out_dtype)

    if params["mode"] == "fold":
        resident = [params["w"], params["b"]]
        operands = (x_in, params["w"], params["b"])
        kernel = _affine_kernel
        flops = 2 * b_rows * x_dim * z_pad
        scratch_bytes = tm_eff * z_pad * 4
    else:
        resident = [params["w1"], params["b1"], params["w2"], params["b2"],
                    params["w34"], params["b34"]]
        operands = (x_in,) + tuple(resident)
        kernel = _mlp3_kernel
        flops = 2 * b_rows * (x_dim * 1024 + 1024 * 512 + 512 * z_pad)
        scratch_bytes = tm_eff * (1024 + 512 + z_pad) * 4

    in_specs = [x_spec] + [_resident_spec(a.shape) for a in resident]

    resident_bytes = sum(int(a.size) * jnp.dtype(a.dtype).itemsize for a in resident)
    per_step_in = tm_eff * x_dim * jnp.dtype(cd).itemsize
    per_step_out = tm_eff * z_pad * jnp.dtype(out_dtype).itemsize
    if vmem_limit_bytes is None:
        vmem_limit_bytes = _vmem_budget(resident_bytes, per_step_in, per_step_out,
                                        scratch_bytes)

    bytes_accessed = (b_rows * x_dim * jnp.dtype(cd).itemsize
                      + b_rows * z_pad * jnp.dtype(out_dtype).itemsize
                      + resident_bytes)
    cost = pl.CostEstimate(flops=flops, transcendentals=0,
                           bytes_accessed=bytes_accessed)

    out = pl.pallas_call(
        kernel,
        out_shape=out_shape,
        grid_spec=pltpu.PrefetchScalarGridSpec(
            num_scalar_prefetch=0,
            grid=grid,
            in_specs=in_specs,
            out_specs=out_spec,
        ),
        compiler_params=pltpu.CompilerParams(
            dimension_semantics=("parallel",),
            vmem_limit_bytes=int(vmem_limit_bytes),
        ),
        cost_estimate=cost,
    )(*operands)

    if b_rows == B and z_pad == z_dim:
        return out
    return out[:B, :z_dim]


# ----------------------------- reference / init -----------------------------

def init_encoder_params(key, x_dim, z_dim, dtype=jnp.float32):
    """Matches PyTorch nn.Linear default init: U(-1/sqrt(fan_in), 1/sqrt(fan_in)).
    Weights stored as [in, out] (transposed from torch's [out, in]), biases [1, out]."""
    dims = [(x_dim, 1024), (1024, 512), (512, 128), (128, z_dim)]
    params = {}
    for idx, (fan_in, fan_out) in enumerate(dims, start=1):
        key, kw, kb = jax.random.split(key, 3)
        bound = 1.0 / jnp.sqrt(jnp.asarray(fan_in, dtype))
        params[f"w{idx}"] = jax.random.uniform(
            kw, (fan_in, fan_out), dtype, minval=-bound, maxval=bound)
        params[f"b{idx}"] = jax.random.uniform(
            kb, (1, fan_out), dtype, minval=-bound, maxval=bound)
    return params


def encoder_reference(x, params):
    h = x @ params["w1"] + params["b1"]
    h = h @ params["w2"] + params["b2"]
    h = h @ params["w3"] + params["b3"]
    return h @ params["w4"] + params["b4"]


if __name__ == "__main__":
    key = jax.random.PRNGKey(0)
    B, x_dim, z_dim = 8, 32, 16

    kx, kp = jax.random.split(key)
    x = jax.random.normal(kx, (B, x_dim), jnp.float32)
    params = init_encoder_params(kp, x_dim, z_dim)
    ref = encoder_reference(x, params)

    # 1) Default path: bf16 compute, f32 accumulation, layers 3+4 pre-folded.
    out_bf16 = jax.block_until_ready(encoder_forward(x, params))
    assert out_bf16.shape == (B, z_dim)
    assert jnp.allclose(out_bf16, ref, atol=1e-1, rtol=1e-1), "bf16 fused mismatch"

    # 2) f32 compute path (tight tolerance).
    out_f32 = jax.block_until_ready(
        encoder_forward(x, params, compute_dtype=jnp.float32))
    assert out_f32.shape == (B, z_dim)
    assert jnp.allclose(out_f32, ref, atol=1e-4, rtol=1e-4), "f32 fused mismatch"

    # 3) Folded single-affine-map inference path, prepared/cached once.
    prepared = prepare_encoder_params(params, compute_dtype=jnp.float32, fold=True)
    out_fold = jax.block_until_ready(encoder_forward(x, prepared))
    assert out_fold.shape == (B, z_dim)
    assert jnp.allclose(out_fold, ref, atol=2e-4, rtol=2e-4), "folded mismatch"

    # 4) Multi-step grid with a ragged last batch tile (no wrapper-side batch pad).
    B2 = 40
    x2 = jax.random.normal(kx, (B2, x_dim), jnp.float32)
    ref2 = encoder_reference(x2, params)
    out2 = jax.block_until_ready(
        encoder_forward(x2, params, tm=16, compute_dtype=jnp.float32))
    assert out2.shape == (B2, z_dim)
    assert jnp.allclose(out2, ref2, atol=1e-4, rtol=1e-4), "ragged grid mismatch"

    print("KERNEL_OK")
</pallas_src>

<mosaic_0001>
module attributes {stable_mosaic.version = 11 : i64} {
  func.func @_mlp3_kernel(%arg0: i32, %arg1: memref<16x32xbf16, #tpu.memory_space<vmem>>, %arg2: memref<32x1024xbf16, #tpu.memory_space<vmem>>, %arg3: memref<1x1024xf32, #tpu.memory_space<vmem>>, %arg4: memref<1024x512xbf16, #tpu.memory_space<vmem>>, %arg5: memref<1x512xf32, #tpu.memory_space<vmem>>, %arg6: memref<512x128xbf16, #tpu.memory_space<vmem>>, %arg7: memref<1x128xf32, #tpu.memory_space<vmem>>, %arg8: memref<16x128xf32, #tpu.memory_space<vmem>>) attributes {dimension_semantics = [#tpu.dimension_semantics<parallel>], iteration_bounds = array<i64: 1>, scalar_prefetch = 0 : i64, scratch_operands = 0 : i64, tpu.core_type = #tpu.core_type<tc>, window_params = [{transform_indices = @transform_0, window_bounds = array<i64: 16, 32>}, {pipeline_mode = #tpu.pipeline_mode<synchronous>, transform_indices = @transform_1, window_bounds = array<i64: 32, 1024>}, {pipeline_mode = #tpu.pipeline_mode<synchronous>, transform_indices = @transform_2, window_bounds = array<i64: 1, 1024>}, {pipeline_mode = #tpu.pipeline_mode<synchronous>, transform_indices = @transform_3, window_bounds = array<i64: 1024, 512>}, {pipeline_mode = #tpu.pipeline_mode<synchronous>, transform_indices = @transform_4, window_bounds = array<i64: 1, 512>}, {pipeline_mode = #tpu.pipeline_mode<synchronous>, transform_indices = @transform_5, window_bounds = array<i64: 512, 128>}, {pipeline_mode = #tpu.pipeline_mode<synchronous>, transform_indices = @transform_6, window_bounds = array<i64: 1, 128>}, {transform_indices = @transform_7, window_bounds = array<i64: 16, 128>}]} {
    %c0 = arith.constant 0 : index
    %c0_0 = arith.constant 0 : index
    %0 = vector.load %arg1[%c0, %c0_0] : memref<16x32xbf16, #tpu.memory_space<vmem>>, vector<16x32xbf16>
    %c0_1 = arith.constant 0 : index
    %c0_2 = arith.constant 0 : index
    %1 = vector.load %arg2[%c0_1, %c0_2] : memref<32x1024xbf16, #tpu.memory_space<vmem>>, vector<32x1024xbf16>
    %cst = arith.constant dense<0.000000e+00> : vector<16x1024xf32>
    %2 = tpu.matmul %0, %1, %cst {dimension_numbers = #tpu.dot_dimension_numbers<[1], [0], [0], [1], [0, 0, 1, 1], [], []>} : vector<16x32xbf16>, vector<32x1024xbf16>, vector<16x1024xf32> -> vector<16x1024xf32>
    %c0_3 = arith.constant 0 : index
    %c0_4 = arith.constant 0 : index
    %3 = vector.load %arg3[%c0_3, %c0_4] : memref<1x1024xf32, #tpu.memory_space<vmem>>, vector<1x1024xf32>
    %4 = vector.broadcast %3 : vector<1x1024xf32> to vector<16x1024xf32>
    %5 = arith.addf %2, %4 : vector<16x1024xf32>
    %6 = arith.truncf %5 : vector<16x1024xf32> to vector<16x1024xbf16>
    %c0_5 = arith.constant 0 : index
    %c0_6 = arith.constant 0 : index
    %7 = vector.load %arg4[%c0_5, %c0_6] : memref<1024x512xbf16, #tpu.memory_space<vmem>>, vector<1024x512xbf16>
    %cst_7 = arith.constant dense<0.000000e+00> : vector<16x512xf32>
    %8 = tpu.matmul %6, %7, %cst_7 {dimension_numbers = #tpu.dot_dimension_numbers<[1], [0], [0], [1], [0, 0, 1, 1], [], []>} : vector<16x1024xbf16>, vector<1024x512xbf16>, vector<16x512xf32> -> vector<16x512xf32>
    %c0_8 = arith.constant 0 : index
    %c0_9 = arith.constant 0 : index
    %9 = vector.load %arg5[%c0_8, %c0_9] : memref<1x512xf32, #tpu.memory_space<vmem>>, vector<1x512xf32>
    %10 = vector.broadcast %9 : vector<1x512xf32> to vector<16x512xf32>
    %11 = arith.addf %8, %10 : vector<16x512xf32>
    %12 = arith.truncf %11 : vector<16x512xf32> to vector<16x512xbf16>
    %c0_10 = arith.constant 0 : index
    %c0_11 = arith.constant 0 : index
    %13 = vector.load %arg6[%c0_10, %c0_11] : memref<512x128xbf16, #tpu.memory_space<vmem>>, vector<512x128xbf16>
    %cst_12 = arith.constant dense<0.000000e+00> : vector<16x128xf32>
    %14 = tpu.matmul %12, %13, %cst_12 {dimension_numbers = #tpu.dot_dimension_numbers<[1], [0], [0], [1], [0, 0, 1, 1], [], []>} : vector<16x512xbf16>, vector<512x128xbf16>, vector<16x128xf32> -> vector<16x128xf32>
    %c0_13 = arith.constant 0 : index
    %c0_14 = arith.constant 0 : index
    %15 = vector.load %arg7[%c0_13, %c0_14] : memref<1x128xf32, #tpu.memory_space<vmem>>, vector<1x128xf32>
    %16 = vector.broadcast %15 : vector<1x128xf32> to vector<16x128xf32>
    %17 = arith.addf %14, %16 : vector<16x128xf32>
    %c0_15 = arith.constant 0 : index
    %c0_16 = arith.constant 0 : index
    %18 = vector.load %arg8[%c0_15, %c0_16] : memref<16x128xf32, #tpu.memory_space<vmem>>, vector<16x128xf32>
    tpu.vector_store %arg8[%c0_15, %c0_16], %17 {strides = array<i32>} : memref<16x128xf32, #tpu.memory_space<vmem>>, vector<16x128xf32>,
    return
  }
  func.func @transform_0(%arg0: i32) -> (i32, i32) {
    %c0_i32 = arith.constant 0 : i32
    %c0_i32_0 = arith.constant 0 : i32
    return %arg0, %c0_i32 : i32, i32
  }
  func.func @transform_1(%arg0: i32) -> (i32, i32) {
    %c0_i32 = arith.constant 0 : i32
    %c0_i32_0 = arith.constant 0 : i32
    %c0_i32_1 = arith.constant 0 : i32
    return %c0_i32, %c0_i32_0 : i32, i32
  }
  func.func @transform_2(%arg0: i32) -> (i32, i32) {
    %c0_i32 = arith.constant 0 : i32
    %c0_i32_0 = arith.constant 0 : i32
    %c0_i32_1 = arith.constant 0 : i32
    return %c0_i32, %c0_i32_0 : i32, i32
  }
  func.func @transform_3(%arg0: i32) -> (i32, i32) {
    %c0_i32 = arith.constant 0 : i32
    %c0_i32_0 = arith.constant 0 : i32
    %c0_i32_1 = arith.constant 0 : i32
    return %c0_i32, %c0_i32_0 : i32, i32
  }
  func.func @transform_4(%arg0: i32) -> (i32, i32) {
    %c0_i32 = arith.constant 0 : i32
    %c0_i32_0 = arith.constant 0 : i32
    %c0_i32_1 = arith.constant 0 : i32
    return %c0_i32, %c0_i32_0 : i32, i32
  }
  func.func @transform_5(%arg0: i32) -> (i32, i32) {
    %c0_i32 = arith.constant 0 : i32
    %c0_i32_0 = arith.constant 0 : i32
    %c0_i32_1 = arith.constant 0 : i32
    return %c0_i32, %c0_i32_0 : i32, i32
  }
  func.func @transform_6(%arg0: i32) -> (i32, i32) {
    %c0_i32 = arith.constant 0 : i32
    %c0_i32_0 = arith.constant 0 : i32
    %c0_i32_1 = arith.constant 0 : i32
    return %c0_i32, %c0_i32_0 : i32, i32
  }
  func.func @transform_7(%arg0: i32) -> (i32, i32) {
    %c0_i32 = arith.constant 0 : i32
    %c0_i32_0 = arith.constant 0 : i32
    return %arg0, %c0_i32 : i32, i32
  }
}

</mosaic_0001>

<bundles_post_ra>
// kernel: tpu_custom_call.1
= control target key start
LH: loop header
LB: loop body
LE: loop exit
PB: predicated region body
PF: predicated region fallthrough
CT: control target
= control target key end

     0   :  { %12 = vsyncpa [#allocation3], 0  ;;  %s3852_s0 = inlined_call_operand.hbm [shape: bf16[16,32], index: 0, kind: input, shape index: {}]   ;;  %s3853_s1 = inlined_call_operand.hbm [shape: bf16[32,1024], index: 1, kind: input, shape index: {}]   ;;  %s3854_s2 = inlined_call_operand.hbm [shape: f32[1,1024], index: 2, kind: input, shape index: {}]   ;;  %s3855_s3 = inlined_call_operand.hbm [shape: bf16[1024,512], index: 3, kind: input, shape index: {}]   ;;  %s3856_s4 = inlined_call_operand.vmem [shape: f32[1,512], index: 4, kind: input, shape index: {}]   ;;  %s3857_s5 = inlined_call_operand.hbm [shape: bf16[512,128], index: 5, kind: input, shape index: {}]   ;;  %s3858_s6 = inlined_call_operand.vmem [shape: f32[1,128], index: 6, kind: input, shape index: {}]   ;;  %s3859_s7 = inlined_call_operand.hbm [shape: f32[16,128], index: 7, kind: output, shape index: {}]  }
   0x1   :  { %13 = vsyncpa [#allocation6], 0 }
   0x2   :  { %14 = vsyncpa [#allocation9], 0 }
   0x3   :  { %15 = vsyncpa [#allocation4], 0  ;;  %s3653_s24 = smov [#allocation5]   ;;  %s3513_s28 = scalar_lea.hbm %s3853_s1, 2048 }
   0x4   :  { %s33_s25 = sshll.u32 %s3653_s24, 4  ;;  %p3514_p0 = scmp.ne.s32.totalorder %s3853_s1, %s3513_s28  ;;  %s34_s25 = int_to_ptr.vmem [resolvable:$true] %s33_s25 }
   0x5   :  { %p3517_p1 = scmp.lt.u32.totalorder %s3513_s28, %s3853_s1 }
   0x7   :  { %p3519_p2 = pnand %p3517_p1, %p3514_p0 }
   0x9   :  { %3522 = shalt.err (!%p3519_p2)
}
   0xa   :  { %s3523_s10 = scalar_lea.vmem %s34_s25, 2048  ;;  %p3528_p4 = scmp.lt.s32.totalorder %s34_s25, %s34_s25 }
   0xb   :  { %p3524_p3 = scmp.ne.s32.totalorder %s34_s25, %s3523_s10  ;;  %p3529_p5 = scmp.lt.s32.totalorder %s3523_s10, %s3523_s10 }
   0xd   :  { %p3530_p6 = por %p3529_p5, %p3528_p4 }
   0xf   :  { %p3531_p7 = pnand %p3530_p6, %p3524_p3 }
  0x11   :  { %3534 = shalt.err (!%p3531_p7)
}
  0x12   :  { %s3654_s11 = smov 512   ;;  %s3655_s12 = smov 32  }
  0x13   :  { %39 = dma.hbm_to_vmem [thread:$0]  %s3853_s1, 2048, %s34_s25, [#allocation6], %s3654_s11, %s3654_s11, %s3655_s12  }
  0x14   :  { %s3656_s15 = smov [#allocation8]   ;;  %s3535_s19 = scalar_lea.hbm %s3855_s3, 32768 }
  0x15   :  { %s55_s16 = sshll.u32 %s3656_s15, 4  ;;  %p3536_p8 = scmp.ne.s32.totalorder %s3855_s3, %s3535_s19  ;;  %s56_s16 = int_to_ptr.vmem [resolvable:$true] %s55_s16 }
  0x16   :  { %p3539_p9 = scmp.lt.u32.totalorder %s3535_s19, %s3855_s3 }
  0x18   :  { %p3541_p10 = pnand %p3539_p9, %p3536_p8 }
  0x1a   :  { %3544 = shalt.err (!%p3541_p10)
}
  0x1b   :  { %s3545_s24 = scalar_lea.vmem %s56_s16, 32768  ;;  %p3550_p12 = scmp.lt.s32.totalorder %s56_s16, %s56_s16 }
  0x1c   :  { %p3546_p11 = scmp.ne.s32.totalorder %s56_s16, %s3545_s24  ;;  %p3551_p13 = scmp.lt.s32.totalorder %s3545_s24, %s3545_s24 }
  0x1e   :  { %p3552_p0 = por %p3551_p13, %p3550_p12 }
  0x20   :  { %p3553_p1 = pnand %p3552_p0, %p3546_p11 }
  0x22   :  { %3556 = shalt.err (!%p3553_p1)
}
  0x23   :  { %s3657_s1 = smov 256   ;;  %s3658_s25 = smov 16  }
  0x24   :  { %61 = dma.hbm_to_vmem [thread:$0]  %s3855_s3, 32768, %s56_s16, [#allocation9], %s3657_s1, %s3657_s1, %s3658_s25  }
  0x25   :  { %s3659_s28 = smov [#allocation2]   ;;  %s3557_s9 = scalar_lea.hbm %s3852_s0, 128 }
  0x26   :  { %s21_s29 = sshll.u32 %s3659_s28, 4  ;;  %p3558_p2 = scmp.ne.s32.totalorder %s3852_s0, %s3557_s9  ;;  %s22_s29 = int_to_ptr.vmem [resolvable:$true] %s21_s29 }
  0x27   :  { %p3561_p3 = scmp.lt.u32.totalorder %s3557_s9, %s3852_s0 }
  0x29   :  { %p3563_p4 = pnand %p3561_p3, %p3558_p2 }
  0x2b   :  { %3566 = shalt.err (!%p3563_p4)
}
  0x2c   :  { %s3567_s14 = scalar_lea.vmem %s22_s29, 128  ;;  %p3572_p6 = scmp.lt.s32.totalorder %s22_s29, %s22_s29 }
  0x2d   :  { %p3568_p5 = scmp.ne.s32.totalorder %s22_s29, %s3567_s14  ;;  %p3573_p7 = scmp.lt.s32.totalorder %s3567_s14, %s3567_s14 }
  0x2f   :  { %p3574_p8 = por %p3573_p7, %p3572_p6 }
  0x31   :  { %p3575_p9 = pnand %p3574_p8, %p3568_p5 }
  0x33   :  { %3578 = shalt.err (!%p3575_p9)
}
  0x34   :  { %s3660_s3 = smov 64   ;;  %s3661_s15 = smov 4  }
  0x35   :  { %27 = dma.hbm_to_vmem [thread:$0]  %s3852_s0, 128, %s22_s29, [#allocation3], %s3660_s3, %s3660_s3, %s3661_s15  }
  0x36   :  { %s3662_s18 = smov [#allocation7]   ;;  %s3663_s20 = smov [#allocation10]  }
  0x37   :  { %s46_s19 = sshll.u32 %s3662_s18, 4  ;;  %s69_s21 = sshll.u32 %s3663_s20, 4  ;;  %s47_s19 = int_to_ptr.vmem [resolvable:$true] %s46_s19  ;;  %s70_s21 = int_to_ptr.vmem [resolvable:$true] %s69_s21 }
  0x38   :  { %s3579_s24 = scalar_lea.hbm %s3854_s2, 128 }
  0x39   :  { %p3580_p10 = scmp.ne.s32.totalorder %s3854_s2, %s3579_s24  ;;  %p3583_p11 = scmp.lt.u32.totalorder %s3579_s24, %s3854_s2 }
  0x3b   :  { %p3585_p12 = pnand %p3583_p11, %p3580_p10 }
  0x3d   :  { %3588 = shalt.err (!%p3585_p12)
}
  0x3e   :  { %s3589_s0 = scalar_lea.vmem %s47_s19, 128  ;;  %p3594_p0 = scmp.lt.s32.totalorder %s47_s19, %s47_s19 }
  0x3f   :  { %p3590_p13 = scmp.ne.s32.totalorder %s47_s19, %s3589_s0  ;;  %p3595_p1 = scmp.lt.s32.totalorder %s3589_s0, %s3589_s0 }
  0x41   :  { %p3596_p2 = por %p3595_p1, %p3594_p0 }
  0x43   :  { %p3597_p3 = pnand %p3596_p2, %p3590_p13 }
  0x45   :  { %3600 = shalt.err (!%p3597_p3)
}
  0x46   :  { %49 = dma.hbm_to_vmem [thread:$0]  %s3854_s2, 128, %s47_s19, [#allocation6]  }
  0x47   :  { %s3601_s9 = scalar_lea.hbm %s3857_s5, 4096 }
  0x48   :  { %p3602_p4 = scmp.ne.s32.totalorder %s3857_s5, %s3601_s9  ;;  %p3605_p5 = scmp.lt.u32.totalorder %s3601_s9, %s3857_s5 }
  0x4a   :  { %p3607_p6 = pnand %p3605_p5, %p3602_p4 }
  0x4c   :  { %3610 = shalt.err (!%p3607_p6)
}
  0x4d   :  { %s3611_s14 = scalar_lea.vmem %s70_s21, 4096  ;;  %p3616_p8 = scmp.lt.s32.totalorder %s70_s21, %s70_s21 }
  0x4e   :  { %p3612_p7 = scmp.ne.s32.totalorder %s70_s21, %s3611_s14  ;;  %p3617_p9 = scmp.lt.s32.totalorder %s3611_s14, %s3611_s14 }
  0x50   :  { %p3618_p10 = por %p3617_p9, %p3616_p8 }
  0x52   :  { %p3619_p11 = pnand %p3618_p10, %p3612_p7 }
  0x54   :  { %3622 = shalt.err (!%p3619_p11)
}
  0x55   :  { %75 = dma.hbm_to_vmem [thread:$0]  %s3857_s5, 4096, %s70_s21, [#allocation9], %s3660_s3, %s3660_s3, %s3661_s15  }
  0x56   :  { %3645 = dma.done.wait [#allocation3], 128  }
  0x57   :  { %3646 = vsyncadd [#allocation3], 4294967168 }
  0x58   :  { %3647 = dma.done.wait [#allocation6], 2176  }
  0x59   :  { %3648 = vsyncadd [#allocation6], 4294965120 }
  0x5a   :  { %3649 = dma.done.wait [#allocation9], 36864  }
  0x5b   :  { %3650 = vsyncadd [#allocation9], 4294930432  ;;  %v3664_v0 = vmov 0   ;;  %v96_v1 = vld [vmem:[#allocation5] sm:$0xff]  ;;  %v97_v8 = vld [vmem:[#allocation5 + $0x8] sm:$0xff]  ;;  %vm239_vm0 = vcmask 261120  }
  0x5c   :  { %275 = vmatprep.mubr.bf16.mxu0 %v3664_v0  ;;  %318 = vmatprep.mubr.bf16.mxu1 %v3664_v0  ;;  %v100_v2 = vld [vmem:[#allocation5 + $0x20] sm:$0xff]  ;;  %v101_v9 = vld [vmem:[#allocation5 + $0x28] sm:$0xff]  ;;  %v98_v14 = vld [vmem:[#allocation5 + $0x10] sm:$0xff]  ;;  %s3665_s17 = smov [#allocation11]  }
  0x5d   :  { %v104_v3 = vld [vmem:[#allocation5 + $0x40] sm:$0xff]  ;;  %v2697_v4 = vcombine.high %v96_v1, %v100_v2  ;;  %v2696_v5 = vcombine.low %v96_v1, %v100_v2  ;;  %v2699_v10 = vcombine.high %v97_v8, %v101_v9  ;;  %v2698_v11 = vcombine.low %v97_v8, %v101_v9  ;;  %v105_v12 = vld [vmem:[#allocation5 + $0x48] sm:$0xff]  ;;  %v102_v17 = vld [vmem:[#allocation5 + $0x30] sm:$0xff]  ;;  %s2681_s18 = sshll.u32 %s3665_s17, 4  ;;  %s2682_s18 = int_to_ptr.vmem [resolvable:$true] %s2681_s18 }
  0x5e   :  { %v108_v6 = vld [vmem:[#allocation5 + $0x60] sm:$0xff]  ;;  %v109_v13 = vld [vmem:[#allocation5 + $0x68] sm:$0xff]  ;;  %v2701_v18 = vcombine.high %v98_v14, %v102_v17  ;;  %v106_v19 = vld [vmem:[#allocation5 + $0x50] sm:$0xff]  ;;  %v2700_v26 = vcombine.low %v98_v14, %v102_v17  ;;  %p3628_p13 = scmp.lt.s32.totalorder %s2682_s18, %s2682_s18 }
  0x5f   :  { %v2705_v7 = vcombine.high %v104_v3, %v108_v6  ;;  %243 = vmatprep.subr.bf16.mxu0 %v2697_v4  ;;  %v2704_v15 = vcombine.low %v104_v3, %v108_v6  ;;  %v2707_v16 = vcombine.high %v105_v12, %v109_v13  ;;  %286 = vmatprep.subr.bf16.mxu1 %v2699_v10  ;;  %v99_v20 = vld [vmem:[#allocation5 + $0x18] sm:$0xff]  ;;  %v110_v23 = vld [vmem:[#allocation5 + $0x70] sm:$0xff] }
  0x60   :  { %244 = vmatpush1.bf16.msra.mxu0 %v2696_v5  ;;  %v103_v21 = vld [vmem:[#allocation5 + $0x38] sm:$0xff]  ;;  %287 = vmatpush1.bf16.msra.mxu1 %v2698_v11  ;;  %v2706_v22 = vcombine.low %v105_v12, %v109_v13  ;;  %v2709_v29 = vcombine.high %v106_v19, %v110_v23  ;;  %v2708_v32 = vcombine.low %v106_v19, %v110_v23  ;;  %v3102_v35 = vld [vmem:[#allocation8 + $0xc] ss:$16 sps:$4 sm:$0xff]   ;;  %v3100_v38 = vld [vmem:[#allocation8 + $0x8] ss:$16 sps:$4 sm:$0xff]  }
  0x61   :  { %245 = vmatprep.subr.bf16.mxu0 %v2705_v7  ;;  %v3096_v24 = vld [vmem:[#allocation2] sm:$0xff]   ;;  %288 = vmatprep.subr.bf16.mxu1 %v2707_v16  ;;  %v2703_v25 = vcombine.high %v99_v20, %v103_v21  ;;  %v2702_v30 = vcombine.low %v99_v20, %v103_v21  ;;  %v3108_v39 = vld [vmem:[#allocation8 + $0x2c] ss:$16 sps:$4 sm:$0xff]   ;;  %v3106_v42 = vld [vmem:[#allocation8 + $0x28] ss:$16 sps:$4 sm:$0xff]  }
  0x62   :  { %v107_v27 = vld [vmem:[#allocation5 + $0x58] sm:$0xff]  ;;  %v3114_v43 = vld [vmem:[#allocation8 + $0x4c] ss:$16 sps:$4 sm:$0xff]   ;;  %v3112_v46 = vld [vmem:[#allocation8 + $0x48] ss:$16 sps:$4 sm:$0xff]  }
  0x63   :  { %v111_v28 = vld [vmem:[#allocation5 + $0x78] sm:$0xff]  ;;  %v3120_v47 = vld [vmem:[#allocation8 + $0x6c] ss:$16 sps:$4 sm:$0xff]   ;;  %v3118_v50 = vld [vmem:[#allocation8 + $0x68] ss:$16 sps:$4 sm:$0xff]  }
  0x64   :  { %246 = vmatpush1.bf16.msra.mxu0 %v2704_v15  ;;  %289 = vmatpush1.bf16.msra.mxu1 %v2706_v22  ;;  %v2711_v31 = vcombine.high %v107_v27, %v111_v28  ;;  %v3099_v33 = vld [vmem:[#allocation8 + $0x4] ss:$16 sps:$4 sm:$0xff]   ;;  %v2710_v34 = vcombine.low %v107_v27, %v111_v28  ;;  %v3097_v36 = vld [vmem:[#allocation8] ss:$16 sps:$4 sm:$0xff]   ;;  %v3126_v51 = vld [vmem:[#allocation8 + $0x8c] ss:$16 sps:$4 sm:$0xff]  }
  0x65   :  { %329 = vmatprep.subr.bf16.mxu0 %v2701_v18  ;;  %372 = vmatprep.subr.bf16.mxu1 %v2703_v25  ;;  %v3105_v37 = vld [vmem:[#allocation8 + $0x24] ss:$16 sps:$4 sm:$0xff]   ;;  %v3103_v40 = vld [vmem:[#allocation8 + $0x20] ss:$16 sps:$4 sm:$0xff]   ;;  %v3124_v54 = vld [vmem:[#allocation8 + $0x88] ss:$16 sps:$4 sm:$0xff]  }
  0x66   :  { %v3111_v41 = vld [vmem:[#allocation8 + $0x44] ss:$16 sps:$4 sm:$0xff]   ;;  %v3109_v44 = vld [vmem:[#allocation8 + $0x40] ss:$16 sps:$4 sm:$0xff]   ;;  %v3132_v55 = vld [vmem:[#allocation8 + $0xac] ss:$16 sps:$4 sm:$0xff]  }
  0x67   :  { %2712 = vmatmul.mubr.msk.bf16.vlgmr.msra.gmra.mrb[0].mxu0 %vm239_vm0, %v3096_v24  ;;  %2713 = vmatmul.mubr.msk.bf16.vlgmr.msra.gmra.mrb[0].mxu1 %vm239_vm0, %v3096_v24  ;;  %v3117_v45 = vld [vmem:[#allocation8 + $0x64] ss:$16 sps:$4 sm:$0xff]   ;;  %v3115_v48 = vld [vmem:[#allocation8 + $0x60] ss:$16 sps:$4 sm:$0xff]   ;;  %v3130_v58 = vld [vmem:[#allocation8 + $0xa8] ss:$16 sps:$4 sm:$0xff]  }
  0x68   :  { %330 = vmatpush1.bf16.msra.mxu0 %v2700_v26  ;;  %361 = vmatprep.mubr.bf16.mxu0 %v3664_v0  ;;  %v3123_v49 = vld [vmem:[#allocation8 + $0x84] ss:$16 sps:$4 sm:$0xff]   ;;  %v3121_v52 = vld [vmem:[#allocation8 + $0x80] ss:$16 sps:$4 sm:$0xff]   ;;  %v3138_v59 = vld [vmem:[#allocation8 + $0xcc] ss:$16 sps:$4 sm:$0xff]  }
  0x69   :  { %331 = vmatprep.subr.bf16.mxu0 %v2709_v29  ;;  %373 = vmatpush1.bf16.msra.mxu1 %v2702_v30  ;;  %v3129_v53 = vld [vmem:[#allocation8 + $0xa4] ss:$16 sps:$4 sm:$0xff]   ;;  %v3127_v56 = vld [vmem:[#allocation8 + $0xa0] ss:$16 sps:$4 sm:$0xff]   ;;  %v3136_v62 = vld [vmem:[#allocation8 + $0xc8] ss:$16 sps:$4 sm:$0xff]  }
  0x6a   :  { %404 = vmatprep.mubr.bf16.mxu1 %v3664_v0  ;;  %374 = vmatprep.subr.bf16.mxu1 %v2711_v31  ;;  %v3135_v57 = vld [vmem:[#allocation8 + $0xc4] ss:$16 sps:$4 sm:$0xff]   ;;  %v3133_v60 = vld [vmem:[#allocation8 + $0xc0] ss:$16 sps:$4 sm:$0xff]   ;;  %v3144_v0 = vld [vmem:[#allocation8 + $0xec] ss:$16 sps:$4 sm:$0xff]  }
  0x6b   :  { %v3141_v61 = vld [vmem:[#allocation8 + $0xe4] ss:$16 sps:$4 sm:$0xff]   ;;  %v3139_v63 = vld [vmem:[#allocation8 + $0xe0] ss:$16 sps:$4 sm:$0xff]   ;;  %v3142_v2 = vld [vmem:[#allocation8 + $0xe8] ss:$16 sps:$4 sm:$0xff]  }
  0x6c   :  { %332 = vmatpush1.bf16.msra.mxu0 %v2708_v32  ;;  %v3147_v1 = vld [vmem:[#allocation8 + $0x104] ss:$16 sps:$4 sm:$0xff]   ;;  %v3150_v3 = vld [vmem:[#allocation8 + $0x10c] ss:$16 sps:$4 sm:$0xff]   ;;  %v3145_v4 = vld [vmem:[#allocation8 + $0x100] ss:$16 sps:$4 sm:$0xff]  }
  0x6d   :  { %1981 = vmatprep.subr.bf16.mxu0 %v3099_v33  ;;  %375 = vmatpush1.bf16.msra.mxu1 %v2710_v34  ;;  %v3153_v5 = vld [vmem:[#allocation8 + $0x124] ss:$16 sps:$4 sm:$0xff]   ;;  %v3148_v6 = vld [vmem:[#allocation8 + $0x108] ss:$16 sps:$4 sm:$0xff]   ;;  %v3156_v7 = vld [vmem:[#allocation8 + $0x12c] ss:$16 sps:$4 sm:$0xff]  }
  0x6e   :  { %2153 = vmatprep.subr.bf16.mxu1 %v3102_v35  ;;  %v3151_v8 = vld [vmem:[#allocation8 + $0x120] ss:$16 sps:$4 sm:$0xff]   ;;  %v3159_v9 = vld [vmem:[#allocation8 + $0x144] ss:$16 sps:$4 sm:$0xff]   ;;  %v3154_v10 = vld [vmem:[#allocation8 + $0x128] ss:$16 sps:$4 sm:$0xff]  }
  0x6f   :  { %2714 = vmatmul.mubr.msk.bf16.vlgmr.msra.gmra.mrb[4].mxu0 %vm239_vm0, %v3096_v24  ;;  %v3162_v11 = vld [vmem:[#allocation8 + $0x14c] ss:$16 sps:$4 sm:$0xff]   ;;  %v3157_v12 = vld [vmem:[#allocation8 + $0x140] ss:$16 sps:$4 sm:$0xff]   ;;  %v3165_v13 = vld [vmem:[#allocation8 + $0x164] ss:$16 sps:$4 sm:$0xff]  }
  0x70   :  { %1982 = vmatpush1.bf16.msra.mxu0 %v3097_v36  ;;  %2715 = vmatmul.mubr.msk.bf16.vlgmr.msra.gmra.mrb[4].mxu1 %vm239_vm0, %v3096_v24  ;;  %v3160_v14 = vld [vmem:[#allocation8 + $0x148] ss:$16 sps:$4 sm:$0xff]   ;;  %v3168_v15 = vld [vmem:[#allocation8 + $0x16c] ss:$16 sps:$4 sm:$0xff]   ;;  %v3163_v16 = vld [vmem:[#allocation8 + $0x160] ss:$16 sps:$4 sm:$0xff]   ;;  %v114_v36 = vlaneseq }
  0x71   :  { %1983 = vmatprep.subr.bf16.mxu0 %v3105_v37  ;;  %2154 = vmatpush1.bf16.msra.mxu1 %v3100_v38  ;;  %v3171_v17 = vld [vmem:[#allocation8 + $0x184] ss:$16 sps:$4 sm:$0xff]   ;;  %v3166_v18 = vld [vmem:[#allocation8 + $0x168] ss:$16 sps:$4 sm:$0xff]   ;;  %v3174_v19 = vld [vmem:[#allocation8 + $0x18c] ss:$16 sps:$4 sm:$0xff]  }
  0x72   :  { %2155 = vmatprep.subr.bf16.mxu1 %v3108_v39  ;;  %v3169_v20 = vld [vmem:[#allocation8 + $0x180] ss:$16 sps:$4 sm:$0xff]   ;;  %v3177_v21 = vld [vmem:[#allocation8 + $0x1a4] ss:$16 sps:$4 sm:$0xff]   ;;  %v3172_v22 = vld [vmem:[#allocation8 + $0x188] ss:$16 sps:$4 sm:$0xff]  }
  0x73   :  { %v3180_v23 = vld [vmem:[#allocation8 + $0x1ac] ss:$16 sps:$4 sm:$0xff]   ;;  %v3175_v24 = vld [vmem:[#allocation8 + $0x1a0] ss:$16 sps:$4 sm:$0xff]   ;;  %v3178_v25 = vld [vmem:[#allocation8 + $0x1a8] ss:$16 sps:$4 sm:$0xff]  }
  0x74   :  { %1984 = vmatpush1.bf16.msra.mxu0 %v3103_v40  ;;  %v3183_v26 = vld [vmem:[#allocation8 + $0x1c4] ss:$16 sps:$4 sm:$0xff]   ;;  %v3186_v27 = vld [vmem:[#allocation8 + $0x1cc] ss:$16 sps:$4 sm:$0xff]   ;;  %v3181_v28 = vld [vmem:[#allocation8 + $0x1c0] ss:$16 sps:$4 sm:$0xff]  }
  0x75   :  { %1985 = vmatprep.subr.bf16.mxu0 %v3111_v41  ;;  %2156 = vmatpush1.bf16.msra.mxu1 %v3106_v42  ;;  %v3184_v29 = vld [vmem:[#allocation8 + $0x1c8] ss:$16 sps:$4 sm:$0xff]   ;;  %v3189_v30 = vld [vmem:[#allocation8 + $0x1e4] ss:$16 sps:$4 sm:$0xff]   ;;  %v3192_v31 = vld [vmem:[#allocation8 + $0x1ec] ss:$16 sps:$4 sm:$0xff]  }
  0x76   :  { %2157 = vmatprep.subr.bf16.mxu1 %v3114_v43  ;;  %v3187_v32 = vld [vmem:[#allocation8 + $0x1e0] ss:$16 sps:$4 sm:$0xff]   ;;  %v3190_v33 = vld [vmem:[#allocation8 + $0x1e8] ss:$16 sps:$4 sm:$0xff]   ;;  %v3195_v34 = vld [vmem:[#allocation8 + $0x204] ss:$16 sps:$4 sm:$0xff]  }
  0x77   :  { %v3198_v35 = vld [vmem:[#allocation8 + $0x20c] ss:$16 sps:$4 sm:$0xff]   ;;  %v3778_v37 = vshrl.u32 %v114_v36, 7 }
  0x78   :  { %1986 = vmatpush1.bf16.msra.mxu0 %v3109_v44  ;;  %v3782_v40 = vld [vmem:[#allocation7] sm:$0xff] }
  0x79   :  { %1987 = vmatprep.subr.bf16.mxu0 %v3117_v45  ;;  %2158 = vmatpush1.bf16.msra.mxu1 %v3112_v46  ;;  %v116_v38 = vsub.s32 0, %v3778_v37  ;;  %v124_v39 = vsub.s32 2, %v3778_v37  ;;  %v120_v41 = vsub.s32 1, %v3778_v37  ;;  %v128_v42 = vsub.s32 3, %v3778_v37  ;;  %v3228_v36 = vld [vmem:[#allocation8 + $0x2ac] ss:$16 sps:$4 sm:$0xff]  }
  0x7a   :  { %2159 = vmatprep.subr.bf16.mxu1 %v3120_v47 }
  0x7b   :  { %v117_v43 = vrot.slane %v3782_v40, %v116_v38  ;;  %v125_v44 = vrot.slane %v3782_v40, %v124_v39  ;;  %v121_v46 = vrot.slane %v3782_v40, %v120_v41  ;;  %v129_v47 = vrot.slane %v3782_v40, %v128_v42 }
  0x7c   :  { %1988 = vmatpush1.bf16.msra.mxu0 %v3115_v48 }
  0x7d   :  { %1989 = vmatprep.subr.bf16.mxu0 %v3123_v49  ;;  %2160 = vmatpush1.bf16.msra.mxu1 %v3118_v50  ;;  %v132_v49 = vsub.s32 4, %v3778_v37 }
  0x7e   :  { %2161 = vmatprep.subr.bf16.mxu1 %v3126_v51 }
  0x80   :  { %1990 = vmatpush1.bf16.msra.mxu0 %v3121_v52  ;;  %v136_v52 = vsub.s32 5, %v3778_v37 }
  0x81   :  { %1991 = vmatprep.subr.bf16.mxu0 %v3129_v53  ;;  %2162 = vmatpush1.bf16.msra.mxu1 %v3124_v54 }
  0x82   :  { %2163 = vmatprep.subr.bf16.mxu1 %v3132_v55 }
  0x84   :  { %1992 = vmatpush1.bf16.msra.mxu0 %v3127_v56 }
  0x85   :  { %1993 = vmatprep.subr.bf16.mxu0 %v3135_v57  ;;  %2164 = vmatpush1.bf16.msra.mxu1 %v3130_v58 }
  0x86   :  { %2165 = vmatprep.subr.bf16.mxu1 %v3138_v59 }
  0x88   :  { %1994 = vmatpush1.bf16.msra.mxu0 %v3133_v60 }
  0x89   :  { %1995 = vmatprep.subr.bf16.mxu0 %v3141_v61  ;;  %2166 = vmatpush1.bf16.msra.mxu1 %v3136_v62 }
  0x8a   :  { %2167 = vmatprep.subr.bf16.mxu1 %v3144_v0 }
  0x8c   :  { %1996 = vmatpush1.bf16.msra.mxu0 %v3139_v63 }
  0x8d   :  { %1997 = vmatprep.subr.bf16.mxu0 %v3147_v1  ;;  %2168 = vmatpush1.bf16.msra.mxu1 %v3142_v2  ;;  %v133_v1 = vrot.slane %v3782_v40, %v132_v49  ;;  %v3234_v49 = vld [vmem:[#allocation8 + $0x2cc] ss:$16 sps:$4 sm:$0xff]  }
  0x8e   :  { %2169 = vmatprep.subr.bf16.mxu1 %v3150_v3  ;;  %v3193_v3 = vld [vmem:[#allocation8 + $0x200] ss:$16 sps:$4 sm:$0xff]  }
  0x90   :  { %1998 = vmatpush1.bf16.msra.mxu0 %v3145_v4  ;;  %v3196_v4 = vld [vmem:[#allocation8 + $0x208] ss:$16 sps:$4 sm:$0xff]  }
  0x91   :  { %1999 = vmatprep.subr.bf16.mxu0 %v3153_v5  ;;  %2170 = vmatpush1.bf16.msra.mxu1 %v3148_v6  ;;  %v137_v6 = vrot.slane %v3782_v40, %v136_v52 }
  0x92   :  { %2171 = vmatprep.subr.bf16.mxu1 %v3156_v7  ;;  %v3201_v7 = vld [vmem:[#allocation8 + $0x224] ss:$16 sps:$4 sm:$0xff]  }
  0x94   :  { %2000 = vmatpush1.bf16.msra.mxu0 %v3151_v8  ;;  %v3204_v8 = vld [vmem:[#allocation8 + $0x22c] ss:$16 sps:$4 sm:$0xff]  }
  0x95   :  { %2001 = vmatprep.subr.bf16.mxu0 %v3159_v9  ;;  %2172 = vmatpush1.bf16.msra.mxu1 %v3154_v10 }
  0x96   :  { %2173 = vmatprep.subr.bf16.mxu1 %v3162_v11 }
  0x98   :  { %2002 = vmatpush1.bf16.msra.mxu0 %v3157_v12 }
  0x99   :  { %2003 = vmatprep.subr.bf16.mxu0 %v3165_v13  ;;  %2174 = vmatpush1.bf16.msra.mxu1 %v3160_v14  ;;  %v3199_v14 = vld [vmem:[#allocation8 + $0x220] ss:$16 sps:$4 sm:$0xff]  }
  0x9a   :  { %2175 = vmatprep.subr.bf16.mxu1 %v3168_v15  ;;  %v3202_v15 = vld [vmem:[#allocation8 + $0x228] ss:$16 sps:$4 sm:$0xff]  }
  0x9c   :  { %2004 = vmatpush1.bf16.msra.mxu0 %v3163_v16 }
  0x9d   :  { %2005 = vmatprep.subr.bf16.mxu0 %v3171_v17  ;;  %2176 = vmatpush1.bf16.msra.mxu1 %v3166_v18  ;;  %v3207_v18 = vld [vmem:[#allocation8 + $0x244] ss:$16 sps:$4 sm:$0xff]  }
  0x9e   :  { %2177 = vmatprep.subr.bf16.mxu1 %v3174_v19  ;;  %v3210_v19 = vld [vmem:[#allocation8 + $0x24c] ss:$16 sps:$4 sm:$0xff]  }
  0xa0   :  { %2006 = vmatpush1.bf16.msra.mxu0 %v3169_v20 }
  0xa1   :  { %2007 = vmatprep.subr.bf16.mxu0 %v3177_v21  ;;  %2178 = vmatpush1.bf16.msra.mxu1 %v3172_v22 }
  0xa2   :  { %2179 = vmatprep.subr.bf16.mxu1 %v3180_v23 }
  0xa4   :  { %2008 = vmatpush1.bf16.msra.mxu0 %v3175_v24  ;;  %v3205_v24 = vld [vmem:[#allocation8 + $0x240] ss:$16 sps:$4 sm:$0xff]  }
  0xa5   :  { %2180 = vmatpush1.bf16.msra.mxu1 %v3178_v25  ;;  %2009 = vmatprep.subr.bf16.mxu0 %v3183_v26  ;;  %v3208_v25 = vld [vmem:[#allocation8 + $0x248] ss:$16 sps:$4 sm:$0xff]  }
  0xa6   :  { %2181 = vmatprep.subr.bf16.mxu1 %v3186_v27  ;;  %v3213_v27 = vld [vmem:[#allocation8 + $0x264] ss:$16 sps:$4 sm:$0xff]  }
  0xa8   :  { %2010 = vmatpush1.bf16.msra.mxu0 %v3181_v28  ;;  %v3216_v28 = vld [vmem:[#allocation8 + $0x26c] ss:$16 sps:$4 sm:$0xff]  }
  0xa9   :  { %2182 = vmatpush1.bf16.msra.mxu1 %v3184_v29  ;;  %2011 = vmatprep.subr.bf16.mxu0 %v3189_v30  ;;  %v3211_v29 = vld [vmem:[#allocation8 + $0x260] ss:$16 sps:$4 sm:$0xff]   ;;  %v3214_v30 = vld [vmem:[#allocation8 + $0x268] ss:$16 sps:$4 sm:$0xff]  }
  0xaa   :  { %2183 = vmatprep.subr.bf16.mxu1 %v3192_v31  ;;  %v3219_v31 = vld [vmem:[#allocation8 + $0x284] ss:$16 sps:$4 sm:$0xff]  }
  0xac   :  { %2012 = vmatpush1.bf16.msra.mxu0 %v3187_v32  ;;  %v3222_v32 = vld [vmem:[#allocation8 + $0x28c] ss:$16 sps:$4 sm:$0xff]  }
  0xad   :  { %2184 = vmatpush1.bf16.msra.mxu1 %v3190_v33  ;;  %2024 = vmatprep.subr.bf16.mxu0 %v3195_v34  ;;  %v3217_v33 = vld [vmem:[#allocation8 + $0x280] ss:$16 sps:$4 sm:$0xff]   ;;  %v3220_v34 = vld [vmem:[#allocation8 + $0x288] ss:$16 sps:$4 sm:$0xff]  }
  0xae   :  { %2196 = vmatprep.subr.bf16.mxu1 %v3198_v35  ;;  %v3225_v35 = vld [vmem:[#allocation8 + $0x2a4] ss:$16 sps:$4 sm:$0xff]  }
 0x13a   :  { %v277_v45 = vpop.f32.mrb[0].mxu0  ;;  %v320_v51 = vpop.f32.mrb[0].mxu1 }
 0x13b   :  { %v279_v48 = vpop.f32.mrb[1].mxu0  ;;  %v278_v53 = vadd.f32 %v277_v45, %v117_v43  ;;  %v321_v56 = vadd.f32 %v320_v51, %v125_v44  ;;  %v322_v57 = vpop.f32.mrb[1].mxu1  ;;  %v140_v45 = vsub.s32 6, %v3778_v37 }
 0x13c   :  { %v281_v50 = vpop.f32.mrb[2].mxu0  ;;  %v280_v58 = vadd.f32 %v279_v48, %v121_v46  ;;  %v323_v60 = vadd.f32 %v322_v57, %v129_v47  ;;  %v324_v61 = vpop.f32.mrb[2].mxu1  ;;  %v3231_v48 = vld [vmem:[#allocation8 + $0x2c4] ss:$16 sps:$4 sm:$0xff]  }
 0x13d   :  { %v282_v54 = vadd.f32 %v281_v50, %v117_v43  ;;  %v283_v55 = vpop.f32.mrb[3].mxu0  ;;  %v325_v63 = vadd.f32 %v324_v61, %v125_v44  ;;  %v326_v0 = vpop.f32.mrb[3].mxu1  ;;  %v3223_v43 = vld [vmem:[#allocation8 + $0x2a0] ss:$16 sps:$4 sm:$0xff]   ;;  %v3226_v44 = vld [vmem:[#allocation8 + $0x2a8] ss:$16 sps:$4 sm:$0xff]   ;;  %v141_v51 = vrot.slane %v3782_v40, %v140_v45 }
 0x13e   :  { %v284_v59 = vadd.f32 %v283_v55, %v121_v46  ;;  %v327_v5 = vadd.f32 %v326_v0, %v129_v47  ;;  %v144_v47 = vsub.s32 7, %v3778_v37  ;;  %v3232_v55 = vld [vmem:[#allocation8 + $0x2c8] ss:$16 sps:$4 sm:$0xff]   ;;  %v3240_v61 = vld [vmem:[#allocation8 + $0x2ec] ss:$16 sps:$4 sm:$0xff]  }
 0x13f   :  { %v415_v62 = vpack.c.bf16 %v282_v54, %v278_v53  ;;  %v3802_v9 = vpack.c.bf16 %v325_v63, %v321_v56  ;;  %v3229_v54 = vld [vmem:[#allocation8 + $0x2c0] ss:$16 sps:$4 sm:$0xff]  }
 0x140   :  { %v416_v2 = vpack.c.bf16 %v284_v59, %v280_v58  ;;  %v418_v10 = vpack.c.bf16 %v327_v5, %v323_v60  ;;  %v145_v52 = vrot.slane %v3782_v40, %v144_v47  ;;  %v3237_v60 = vld [vmem:[#allocation8 + $0x2e4] ss:$16 sps:$4 sm:$0xff]   ;;  %v3235_v40 = vld [vmem:[#allocation8 + $0x2e0] ss:$16 sps:$4 sm:$0xff]   ;;  %v3244_v5 = vld [vmem:[#allocation8 + $0x308] ss:$16 sps:$4 sm:$0xff]  }
 0x141   :  { %v3289_v45 = vld [vmem:[#allocation8 + $0x400] ss:$16 sps:$4 sm:$0xff]   ;;  %v3297_v47 = vld [vmem:[#allocation8 + $0x424] ss:$16 sps:$4 sm:$0xff]  }
 0x142   :  { %2013 = vmatprep.mubr.bf16.mxu0 %v416_v2  ;;  %2185 = vmatprep.mubr.bf16.mxu1 %v416_v2  ;;  %v363_v11 = vpop.f32.mrb[4].mxu0  ;;  %v3243_v2 = vld [vmem:[#allocation8 + $0x304] ss:$16 sps:$4 sm:$0xff]  }
 0x143   :  { %2014 = vmatmul.mubr.bf16.vlgmr.msra.gmra.mrb[8].mxu0 %v415_v62  ;;  %2186 = vmatmul.mubr.bf16.vlgmr.msra.gmra.mrb[8].mxu1 %v415_v62  ;;  %v364_v12 = vadd.f32 %v363_v11, %v133_v1  ;;  %v365_v13 = vpop.f32.mrb[5].mxu0  ;;  %v406_v46 = vpop.f32.mrb[4].mxu1  ;;  %v3255_v11 = vld [vmem:[#allocation8 + $0x344] ss:$16 sps:$4 sm:$0xff]  }
 0x144   :  { %2025 = vmatpush1.bf16.msra.mxu0 %v3193_v3  ;;  %2197 = vmatpush1.bf16.msra.mxu1 %v3196_v4  ;;  %v366_v16 = vadd.f32 %v365_v13, %v137_v6  ;;  %v367_v17 = vpop.f32.mrb[6].mxu0  ;;  %v408_v50 = vpop.f32.mrb[5].mxu1  ;;  %v407_v56 = vadd.f32 %v406_v46, %v141_v51  ;;  %v3246_v3 = vld [vmem:[#allocation8 + $0x30c] ss:$16 sps:$4 sm:$0xff]   ;;  %v3241_v4 = vld [vmem:[#allocation8 + $0x300] ss:$16 sps:$4 sm:$0xff]  }
 0x145   :  { %2026 = vmatprep.subr.bf16.mxu0 %v3201_v7  ;;  %2198 = vmatprep.subr.bf16.mxu1 %v3204_v8  ;;  %v368_v20 = vadd.f32 %v367_v17, %v133_v1  ;;  %v369_v21 = vpop.f32.mrb[7].mxu0  ;;  %v410_v53 = vpop.f32.mrb[6].mxu1  ;;  %v409_v57 = vadd.f32 %v408_v50, %v145_v52  ;;  %v3238_v1 = vld [vmem:[#allocation8 + $0x2e8] ss:$16 sps:$4 sm:$0xff]   ;;  %v3252_v7 = vld [vmem:[#allocation8 + $0x32c] ss:$16 sps:$4 sm:$0xff]  }
 0x146   :  { %2056 = vmatprep.mubr.bf16.mxu0 %v418_v10  ;;  %2228 = vmatprep.mubr.bf16.mxu1 %v418_v10  ;;  %v370_v22 = vadd.f32 %v369_v21, %v137_v6  ;;  %v411_v58 = vadd.f32 %v410_v53, %v141_v51  ;;  %v412_v59 = vpop.f32.mrb[7].mxu1  ;;  %v3249_v6 = vld [vmem:[#allocation8 + $0x324] ss:$16 sps:$4 sm:$0xff]   ;;  %v3247_v8 = vld [vmem:[#allocation8 + $0x320] ss:$16 sps:$4 sm:$0xff]  }
 0x147   :  { %v3804_v23 = vpack.c.bf16 %v368_v20, %v364_v12  ;;  %v413_v62 = vadd.f32 %v412_v59, %v145_v52  ;;  %v3250_v10 = vld [vmem:[#allocation8 + $0x328] ss:$16 sps:$4 sm:$0xff]   ;;  %v3258_v12 = vld [vmem:[#allocation8 + $0x34c] ss:$16 sps:$4 sm:$0xff]   ;;  %v3253_v13 = vld [vmem:[#allocation8 + $0x340] ss:$16 sps:$4 sm:$0xff]  }
 0x148   :  { %2027 = vmatpush1.bf16.msra.mxu0 %v3199_v14  ;;  %2199 = vmatpush1.bf16.msra.mxu1 %v3202_v15  ;;  %v3806_v26 = vpack.c.bf16 %v370_v22, %v366_v16  ;;  %v3812_v63 = vpack.c.bf16 %v411_v58, %v407_v56  ;;  %v3256_v14 = vld [vmem:[#allocation8 + $0x348] ss:$16 sps:$4 sm:$0xff]   ;;  %v3261_v15 = vld [vmem:[#allocation8 + $0x364] ss:$16 sps:$4 sm:$0xff]   ;;  %v3264_v16 = vld [vmem:[#allocation8 + $0x36c] ss:$16 sps:$4 sm:$0xff]  }
 0x149   :  { %2028 = vmatprep.subr.bf16.mxu0 %v3207_v18  ;;  %2200 = vmatprep.subr.bf16.mxu1 %v3210_v19  ;;  %v3814_v0 = vpack.c.bf16 %v413_v62, %v409_v57  ;;  %v3259_v17 = vld [vmem:[#allocation8 + $0x360] ss:$16 sps:$4 sm:$0xff]   ;;  %v3262_v18 = vld [vmem:[#allocation8 + $0x368] ss:$16 sps:$4 sm:$0xff]   ;;  %v3267_v19 = vld [vmem:[#allocation8 + $0x384] ss:$16 sps:$4 sm:$0xff]  }
 0x14a   :  { %v3270_v20 = vld [vmem:[#allocation8 + $0x38c] ss:$16 sps:$4 sm:$0xff]   ;;  %v3265_v21 = vld [vmem:[#allocation8 + $0x380] ss:$16 sps:$4 sm:$0xff]   ;;  %v3268_v22 = vld [vmem:[#allocation8 + $0x388] ss:$16 sps:$4 sm:$0xff]  }
 0x14b   :  { %v3292_v46 = vld [vmem:[#allocation8 + $0x408] ss:$16 sps:$4 sm:$0xff]   ;;  %v3303_v51 = vld [vmem:[#allocation8 + $0x444] ss:$16 sps:$4 sm:$0xff]   ;;  %v3306_v52 = vld [vmem:[#allocation8 + $0x44c] ss:$16 sps:$4 sm:$0xff]  }
 0x14c   :  { %2029 = vmatpush1.bf16.msra.mxu0 %v3205_v24  ;;  %2201 = vmatpush1.bf16.msra.mxu1 %v3208_v25  ;;  %v3273_v24 = vld [vmem:[#allocation8 + $0x3a4] ss:$16 sps:$4 sm:$0xff]   ;;  %v3276_v25 = vld [vmem:[#allocation8 + $0x3ac] ss:$16 sps:$4 sm:$0xff]   ;;  %v3298_v50 = vld [vmem:[#allocation8 + $0x428] ss:$16 sps:$4 sm:$0xff]  }
 0x14d   :  { %2030 = vmatprep.subr.bf16.mxu0 %v3213_v27  ;;  %2202 = vmatprep.subr.bf16.mxu1 %v3216_v28  ;;  %v3271_v27 = vld [vmem:[#allocation8 + $0x3a0] ss:$16 sps:$4 sm:$0xff]   ;;  %v3274_v28 = vld [vmem:[#allocation8 + $0x3a8] ss:$16 sps:$4 sm:$0xff]   ;;  %v3315_v58 = vld [vmem:[#allocation8 + $0x484] ss:$16 sps:$4 sm:$0xff]  }
 0x14e   :  { %v3301_v53 = vld [vmem:[#allocation8 + $0x440] ss:$16 sps:$4 sm:$0xff]   ;;  %v3310_v57 = vld [vmem:[#allocation8 + $0x468] ss:$16 sps:$4 sm:$0xff]   ;;  %v3318_v59 = vld [vmem:[#allocation8 + $0x48c] ss:$16 sps:$4 sm:$0xff]  }
 0x14f   :  { %v3307_v56 = vld [vmem:[#allocation8 + $0x460] ss:$16 sps:$4 sm:$0xff]   ;;  %v3324_v62 = vld [vmem:[#allocation8 + $0x4ac] ss:$16 sps:$4 sm:$0xff]  }
 0x150   :  { %2031 = vmatpush1.bf16.msra.mxu0 %v3211_v29  ;;  %2203 = vmatpush1.bf16.msra.mxu1 %v3214_v30  ;;  %v3279_v29 = vld [vmem:[#allocation8 + $0x3c4] ss:$16 sps:$4 sm:$0xff]   ;;  %v3282_v30 = vld [vmem:[#allocation8 + $0x3cc] ss:$16 sps:$4 sm:$0xff]  }
 0x151   :  { %2032 = vmatprep.subr.bf16.mxu0 %v3219_v31  ;;  %2204 = vmatprep.subr.bf16.mxu1 %v3222_v32  ;;  %v3277_v31 = vld [vmem:[#allocation8 + $0x3c0] ss:$16 sps:$4 sm:$0xff]   ;;  %v3280_v32 = vld [vmem:[#allocation8 + $0x3c8] ss:$16 sps:$4 sm:$0xff]  }
 0x154   :  { %2033 = vmatpush1.bf16.msra.mxu0 %v3217_v33  ;;  %2205 = vmatpush1.bf16.msra.mxu1 %v3220_v34  ;;  %v3285_v33 = vld [vmem:[#allocation8 + $0x3e4] ss:$16 sps:$4 sm:$0xff]   ;;  %v3288_v34 = vld [vmem:[#allocation8 + $0x3ec] ss:$16 sps:$4 sm:$0xff]  }
 0x155   :  { %2034 = vmatprep.subr.bf16.mxu0 %v3225_v35  ;;  %2206 = vmatprep.subr.bf16.mxu1 %v3228_v36  ;;  %v3283_v35 = vld [vmem:[#allocation8 + $0x3e0] ss:$16 sps:$4 sm:$0xff]   ;;  %v3286_v36 = vld [vmem:[#allocation8 + $0x3e8] ss:$16 sps:$4 sm:$0xff]  }
 0x158   :  { %2035 = vmatpush1.bf16.msra.mxu0 %v3223_v43  ;;  %2207 = vmatpush1.bf16.msra.mxu1 %v3226_v44  ;;  %v3291_v43 = vld [vmem:[#allocation8 + $0x404] ss:$16 sps:$4 sm:$0xff]   ;;  %v3294_v44 = vld [vmem:[#allocation8 + $0x40c] ss:$16 sps:$4 sm:$0xff]  }
 0x159   :  { %2036 = vmatprep.subr.bf16.mxu0 %v3231_v48  ;;  %2208 = vmatprep.subr.bf16.mxu1 %v3234_v49  ;;  %v3300_v48 = vld [vmem:[#allocation8 + $0x42c] ss:$16 sps:$4 sm:$0xff]   ;;  %v3295_v49 = vld [vmem:[#allocation8 + $0x420] ss:$16 sps:$4 sm:$0xff]  }
 0x15c   :  { %2037 = vmatpush1.bf16.msra.mxu0 %v3229_v54  ;;  %2209 = vmatpush1.bf16.msra.mxu1 %v3232_v55  ;;  %v3304_v54 = vld [vmem:[#allocation8 + $0x448] ss:$16 sps:$4 sm:$0xff]   ;;  %v3309_v55 = vld [vmem:[#allocation8 + $0x464] ss:$16 sps:$4 sm:$0xff]  }
 0x15d   :  { %2038 = vmatprep.subr.bf16.mxu0 %v3237_v60  ;;  %2210 = vmatprep.subr.bf16.mxu1 %v3240_v61  ;;  %v3313_v60 = vld [vmem:[#allocation8 + $0x480] ss:$16 sps:$4 sm:$0xff]   ;;  %v3321_v61 = vld [vmem:[#allocation8 + $0x4a4] ss:$16 sps:$4 sm:$0xff]  }
 0x160   :  { %2039 = vmatpush1.bf16.msra.mxu0 %v3235_v40  ;;  %2211 = vmatpush1.bf16.msra.mxu1 %v3238_v1  ;;  %v3319_v40 = vld [vmem:[#allocation8 + $0x4a0] ss:$16 sps:$4 sm:$0xff]   ;;  %v3322_v1 = vld [vmem:[#allocation8 + $0x4a8] ss:$16 sps:$4 sm:$0xff]  }
 0x161   :  { %2040 = vmatprep.subr.bf16.mxu0 %v3243_v2  ;;  %2212 = vmatprep.subr.bf16.mxu1 %v3246_v3  ;;  %v3327_v2 = vld [vmem:[#allocation8 + $0x4c4] ss:$16 sps:$4 sm:$0xff]   ;;  %v3330_v3 = vld [vmem:[#allocation8 + $0x4cc] ss:$16 sps:$4 sm:$0xff]  }
 0x164   :  { %2041 = vmatpush1.bf16.msra.mxu0 %v3241_v4  ;;  %2213 = vmatpush1.bf16.msra.mxu1 %v3244_v5  ;;  %v3325_v4 = vld [vmem:[#allocation8 + $0x4c0] ss:$16 sps:$4 sm:$0xff]   ;;  %v3328_v5 = vld [vmem:[#allocation8 + $0x4c8] ss:$16 sps:$4 sm:$0xff]  }
 0x165   :  { %2042 = vmatprep.subr.bf16.mxu0 %v3249_v6  ;;  %2214 = vmatprep.subr.bf16.mxu1 %v3252_v7  ;;  %v3333_v6 = vld [vmem:[#allocation8 + $0x4e4] ss:$16 sps:$4 sm:$0xff]   ;;  %v3336_v7 = vld [vmem:[#allocation8 + $0x4ec] ss:$16 sps:$4 sm:$0xff]  }
 0x168   :  { %2043 = vmatpush1.bf16.msra.mxu0 %v3247_v8  ;;  %2215 = vmatpush1.bf16.msra.mxu1 %v3250_v10  ;;  %v3331_v8 = vld [vmem:[#allocation8 + $0x4e0] ss:$16 sps:$4 sm:$0xff]   ;;  %v3334_v10 = vld [vmem:[#allocation8 + $0x4e8] ss:$16 sps:$4 sm:$0xff]  }
 0x169   :  { %2044 = vmatprep.subr.bf16.mxu0 %v3255_v11  ;;  %2216 = vmatprep.subr.bf16.mxu1 %v3258_v12  ;;  %v3339_v11 = vld [vmem:[#allocation8 + $0x504] ss:$16 sps:$4 sm:$0xff]   ;;  %v3342_v12 = vld [vmem:[#allocation8 + $0x50c] ss:$16 sps:$4 sm:$0xff]  }
 0x16c   :  { %2045 = vmatpush1.bf16.msra.mxu0 %v3253_v13  ;;  %2217 = vmatpush1.bf16.msra.mxu1 %v3256_v14  ;;  %v3337_v13 = vld [vmem:[#allocation8 + $0x500] ss:$16 sps:$4 sm:$0xff]   ;;  %v3340_v14 = vld [vmem:[#allocation8 + $0x508] ss:$16 sps:$4 sm:$0xff]  }
 0x16d   :  { %2046 = vmatprep.subr.bf16.mxu0 %v3261_v15  ;;  %2218 = vmatprep.subr.bf16.mxu1 %v3264_v16  ;;  %v3345_v15 = vld [vmem:[#allocation8 + $0x524] ss:$16 sps:$4 sm:$0xff]   ;;  %v3348_v16 = vld [vmem:[#allocation8 + $0x52c] ss:$16 sps:$4 sm:$0xff]  }
 0x170   :  { %2047 = vmatpush1.bf16.msra.mxu0 %v3259_v17  ;;  %2219 = vmatpush1.bf16.msra.mxu1 %v3262_v18  ;;  %v3343_v17 = vld [vmem:[#allocation8 + $0x520] ss:$16 sps:$4 sm:$0xff]   ;;  %v3346_v18 = vld [vmem:[#allocation8 + $0x528] ss:$16 sps:$4 sm:$0xff]  }
 0x171   :  { %2048 = vmatprep.subr.bf16.mxu0 %v3267_v19  ;;  %2220 = vmatprep.subr.bf16.mxu1 %v3270_v20  ;;  %v3351_v19 = vld [vmem:[#allocation8 + $0x544] ss:$16 sps:$4 sm:$0xff]   ;;  %v3354_v20 = vld [vmem:[#allocation8 + $0x54c] ss:$16 sps:$4 sm:$0xff]  }
 0x174   :  { %2049 = vmatpush1.bf16.msra.mxu0 %v3265_v21  ;;  %2221 = vmatpush1.bf16.msra.mxu1 %v3268_v22  ;;  %v3349_v21 = vld [vmem:[#allocation8 + $0x540] ss:$16 sps:$4 sm:$0xff]   ;;  %v3352_v22 = vld [vmem:[#allocation8 + $0x548] ss:$16 sps:$4 sm:$0xff]  }
 0x175   :  { %2050 = vmatprep.subr.bf16.mxu0 %v3273_v24  ;;  %2222 = vmatprep.subr.bf16.mxu1 %v3276_v25  ;;  %v3357_v24 = vld [vmem:[#allocation8 + $0x564] ss:$16 sps:$4 sm:$0xff]   ;;  %v3360_v25 = vld [vmem:[#allocation8 + $0x56c] ss:$16 sps:$4 sm:$0xff]  }
 0x178   :  { %2051 = vmatpush1.bf16.msra.mxu0 %v3271_v27  ;;  %2223 = vmatpush1.bf16.msra.mxu1 %v3274_v28  ;;  %v3355_v27 = vld [vmem:[#allocation8 + $0x560] ss:$16 sps:$4 sm:$0xff]   ;;  %v3358_v28 = vld [vmem:[#allocation8 + $0x568] ss:$16 sps:$4 sm:$0xff]  }
 0x179   :  { %2052 = vmatprep.subr.bf16.mxu0 %v3279_v29  ;;  %2224 = vmatprep.subr.bf16.mxu1 %v3282_v30  ;;  %v3363_v29 = vld [vmem:[#allocation8 + $0x584] ss:$16 sps:$4 sm:$0xff]   ;;  %v3366_v30 = vld [vmem:[#allocation8 + $0x58c] ss:$16 sps:$4 sm:$0xff]  }
 0x17c   :  { %2053 = vmatpush1.bf16.msra.mxu0 %v3277_v31  ;;  %2225 = vmatpush1.bf16.msra.mxu1 %v3280_v32  ;;  %v3361_v31 = vld [vmem:[#allocation8 + $0x580] ss:$16 sps:$4 sm:$0xff]   ;;  %v3364_v32 = vld [vmem:[#allocation8 + $0x588] ss:$16 sps:$4 sm:$0xff]  }
 0x17d   :  { %2054 = vmatprep.subr.bf16.mxu0 %v3285_v33  ;;  %2226 = vmatprep.subr.bf16.mxu1 %v3288_v34  ;;  %v3369_v33 = vld [vmem:[#allocation8 + $0x5a4] ss:$16 sps:$4 sm:$0xff]   ;;  %v3372_v34 = vld [vmem:[#allocation8 + $0x5ac] ss:$16 sps:$4 sm:$0xff]  }
 0x180   :  { %2055 = vmatpush1.bf16.msra.mxu0 %v3283_v35  ;;  %2227 = vmatpush1.bf16.msra.mxu1 %v3286_v36  ;;  %v3367_v35 = vld [vmem:[#allocation8 + $0x5a0] ss:$16 sps:$4 sm:$0xff]   ;;  %v3370_v36 = vld [vmem:[#allocation8 + $0x5a8] ss:$16 sps:$4 sm:$0xff]  }
 0x181   :  { %2067 = vmatprep.subr.bf16.mxu0 %v3291_v43  ;;  %2239 = vmatprep.subr.bf16.mxu1 %v3294_v44  ;;  %v3375_v43 = vld [vmem:[#allocation8 + $0x5c4] ss:$16 sps:$4 sm:$0xff]   ;;  %v3378_v44 = vld [vmem:[#allocation8 + $0x5cc] ss:$16 sps:$4 sm:$0xff]  }
 0x183   :  { %2057 = vmatmul.mubr.bf16.vlgmr.msra.gmra.mrb[8].mxu0 %v3802_v9  ;;  %2229 = vmatmul.mubr.bf16.vlgmr.msra.gmra.mrb[8].mxu1 %v3802_v9  ;;  %v3312_v9 = vld [vmem:[#allocation8 + $0x46c] ss:$16 sps:$4 sm:$0xff]  }
 0x184   :  { %2068 = vmatpush1.bf16.msra.mxu0 %v3289_v45  ;;  %2240 = vmatpush1.bf16.msra.mxu1 %v3292_v46  ;;  %v3373_v45 = vld [vmem:[#allocation8 + $0x5c0] ss:$16 sps:$4 sm:$0xff]   ;;  %v3376_v46 = vld [vmem:[#allocation8 + $0x5c8] ss:$16 sps:$4 sm:$0xff]  }
 0x185   :  { %2069 = vmatprep.subr.bf16.mxu0 %v3297_v47  ;;  %2241 = vmatprep.subr.bf16.mxu1 %v3300_v48  ;;  %v3381_v47 = vld [vmem:[#allocation8 + $0x5e4] ss:$16 sps:$4 sm:$0xff]   ;;  %v3384_v48 = vld [vmem:[#allocation8 + $0x5ec] ss:$16 sps:$4 sm:$0xff]  }
 0x186   :  { %2099 = vmatprep.mubr.bf16.mxu0 %v3806_v26  ;;  %2271 = vmatprep.mubr.bf16.mxu1 %v3806_v26  ;;  %v3316_v26 = vld [vmem:[#allocation8 + $0x488] ss:$16 sps:$4 sm:$0xff]  }
 0x188   :  { %2070 = vmatpush1.bf16.msra.mxu0 %v3295_v49  ;;  %2242 = vmatpush1.bf16.msra.mxu1 %v3298_v50  ;;  %v3379_v49 = vld [vmem:[#allocation8 + $0x5e0] ss:$16 sps:$4 sm:$0xff]   ;;  %v3382_v50 = vld [vmem:[#allocation8 + $0x5e8] ss:$16 sps:$4 sm:$0xff]  }
 0x189   :  { %2071 = vmatprep.subr.bf16.mxu0 %v3303_v51  ;;  %2243 = vmatprep.subr.bf16.mxu1 %v3306_v52  ;;  %v3387_v51 = vld [vmem:[#allocation8 + $0x604] ss:$16 sps:$4 sm:$0xff]   ;;  %v3390_v52 = vld [vmem:[#allocation8 + $0x60c] ss:$16 sps:$4 sm:$0xff]  }
 0x18c   :  { %2072 = vmatpush1.bf16.msra.mxu0 %v3301_v53  ;;  %2244 = vmatpush1.bf16.msra.mxu1 %v3304_v54  ;;  %v3385_v53 = vld [vmem:[#allocation8 + $0x600] ss:$16 sps:$4 sm:$0xff]   ;;  %v3388_v54 = vld [vmem:[#allocation8 + $0x608] ss:$16 sps:$4 sm:$0xff]  }
 0x18d   :  { %2073 = vmatprep.subr.bf16.mxu0 %v3309_v55  ;;  %2245 = vmatprep.subr.bf16.mxu1 %v3312_v9  ;;  %v3393_v55 = vld [vmem:[#allocation8 + $0x624] ss:$16 sps:$4 sm:$0xff]   ;;  %v3396_v9 = vld [vmem:[#allocation8 + $0x62c] ss:$16 sps:$4 sm:$0xff]  }
 0x190   :  { %2074 = vmatpush1.bf16.msra.mxu0 %v3307_v56  ;;  %2246 = vmatpush1.bf16.msra.mxu1 %v3310_v57  ;;  %v3391_v56 = vld [vmem:[#allocation8 + $0x620] ss:$16 sps:$4 sm:$0xff]   ;;  %v3394_v57 = vld [vmem:[#allocation8 + $0x628] ss:$16 sps:$4 sm:$0xff]  }
 0x191   :  { %2075 = vmatprep.subr.bf16.mxu0 %v3315_v58  ;;  %2247 = vmatprep.subr.bf16.mxu1 %v3318_v59  ;;  %v3399_v58 = vld [vmem:[#allocation8 + $0x644] ss:$16 sps:$4 sm:$0xff]   ;;  %v3402_v59 = vld [vmem:[#allocation8 + $0x64c] ss:$16 sps:$4 sm:$0xff]  }
 0x194   :  { %2076 = vmatpush1.bf16.msra.mxu0 %v3313_v60  ;;  %2248 = vmatpush1.bf16.msra.mxu1 %v3316_v26  ;;  %v3397_v60 = vld [vmem:[#allocation8 + $0x640] ss:$16 sps:$4 sm:$0xff]   ;;  %v3400_v26 = vld [vmem:[#allocation8 + $0x648] ss:$16 sps:$4 sm:$0xff]  }
 0x195   :  { %2077 = vmatprep.subr.bf16.mxu0 %v3321_v61  ;;  %2249 = vmatprep.subr.bf16.mxu1 %v3324_v62  ;;  %v3405_v61 = vld [vmem:[#allocation8 + $0x664] ss:$16 sps:$4 sm:$0xff]   ;;  %v3403_v62 = vld [vmem:[#allocation8 + $0x660] ss:$16 sps:$4 sm:$0xff]  }
 0x198   :  { %2078 = vmatpush1.bf16.msra.mxu0 %v3319_v40  ;;  %2250 = vmatpush1.bf16.msra.mxu1 %v3322_v1  ;;  %v3406_v40 = vld [vmem:[#allocation8 + $0x668] ss:$16 sps:$4 sm:$0xff]   ;;  %v3411_v1 = vld [vmem:[#allocation8 + $0x684] ss:$16 sps:$4 sm:$0xff]  }
 0x199   :  { %2079 = vmatprep.subr.bf16.mxu0 %v3327_v2  ;;  %2251 = vmatprep.subr.bf16.mxu1 %v3330_v3  ;;  %v3414_v2 = vld [vmem:[#allocation8 + $0x68c] ss:$16 sps:$4 sm:$0xff]   ;;  %v3409_v3 = vld [vmem:[#allocation8 + $0x680] ss:$16 sps:$4 sm:$0xff]  }
 0x19c   :  { %2080 = vmatpush1.bf16.msra.mxu0 %v3325_v4  ;;  %2252 = vmatpush1.bf16.msra.mxu1 %v3328_v5  ;;  %v3417_v4 = vld [vmem:[#allocation8 + $0x6a4] ss:$16 sps:$4 sm:$0xff]   ;;  %v3420_v5 = vld [vmem:[#allocation8 + $0x6ac] ss:$16 sps:$4 sm:$0xff]  }
 0x19d   :  { %2081 = vmatprep.subr.bf16.mxu0 %v3333_v6  ;;  %2253 = vmatprep.subr.bf16.mxu1 %v3336_v7  ;;  %v3415_v6 = vld [vmem:[#allocation8 + $0x6a0] ss:$16 sps:$4 sm:$0xff]   ;;  %v3418_v7 = vld [vmem:[#allocation8 + $0x6a8] ss:$16 sps:$4 sm:$0xff]  }
 0x1a0   :  { %2082 = vmatpush1.bf16.msra.mxu0 %v3331_v8  ;;  %2254 = vmatpush1.bf16.msra.mxu1 %v3334_v10  ;;  %v3423_v8 = vld [vmem:[#allocation8 + $0x6c4] ss:$16 sps:$4 sm:$0xff]   ;;  %v3426_v10 = vld [vmem:[#allocation8 + $0x6cc] ss:$16 sps:$4 sm:$0xff]  }
 0x1a1   :  { %2083 = vmatprep.subr.bf16.mxu0 %v3339_v11  ;;  %2255 = vmatprep.subr.bf16.mxu1 %v3342_v12  ;;  %v3421_v11 = vld [vmem:[#allocation8 + $0x6c0] ss:$16 sps:$4 sm:$0xff]   ;;  %v3424_v12 = vld [vmem:[#allocation8 + $0x6c8] ss:$16 sps:$4 sm:$0xff]  }
 0x1a4   :  { %2084 = vmatpush1.bf16.msra.mxu0 %v3337_v13  ;;  %2256 = vmatpush1.bf16.msra.mxu1 %v3340_v14  ;;  %v3429_v13 = vld [vmem:[#allocation8 + $0x6e4] ss:$16 sps:$4 sm:$0xff]   ;;  %v3432_v14 = vld [vmem:[#allocation8 + $0x6ec] ss:$16 sps:$4 sm:$0xff]  }
 0x1a5   :  { %2085 = vmatprep.subr.bf16.mxu0 %v3345_v15  ;;  %2257 = vmatprep.subr.bf16.mxu1 %v3348_v16  ;;  %v3427_v15 = vld [vmem:[#allocation8 + $0x6e0] ss:$16 sps:$4 sm:$0xff]   ;;  %v3430_v16 = vld [vmem:[#allocation8 + $0x6e8] ss:$16 sps:$4 sm:$0xff]  }
 0x1a8   :  { %2086 = vmatpush1.bf16.msra.mxu0 %v3343_v17  ;;  %2258 = vmatpush1.bf16.msra.mxu1 %v3346_v18  ;;  %v3435_v17 = vld [vmem:[#allocation8 + $0x704] ss:$16 sps:$4 sm:$0xff]   ;;  %v3438_v18 = vld [vmem:[#allocation8 + $0x70c] ss:$16 sps:$4 sm:$0xff]  }
 0x1a9   :  { %2087 = vmatprep.subr.bf16.mxu0 %v3351_v19  ;;  %2259 = vmatprep.subr.bf16.mxu1 %v3354_v20  ;;  %v3433_v19 = vld [vmem:[#allocation8 + $0x700] ss:$16 sps:$4 sm:$0xff]   ;;  %v3436_v20 = vld [vmem:[#allocation8 + $0x708] ss:$16 sps:$4 sm:$0xff]  }
 0x1ac   :  { %2088 = vmatpush1.bf16.msra.mxu0 %v3349_v21  ;;  %2260 = vmatpush1.bf16.msra.mxu1 %v3352_v22  ;;  %v3441_v21 = vld [vmem:[#allocation8 + $0x724] ss:$16 sps:$4 sm:$0xff]   ;;  %v3444_v22 = vld [vmem:[#allocation8 + $0x72c] ss:$16 sps:$4 sm:$0xff]  }
 0x1ad   :  { %2089 = vmatprep.subr.bf16.mxu0 %v3357_v24  ;;  %2261 = vmatprep.subr.bf16.mxu1 %v3360_v25  ;;  %v3439_v24 = vld [vmem:[#allocation8 + $0x720] ss:$16 sps:$4 sm:$0xff]   ;;  %v3442_v25 = vld [vmem:[#allocation8 + $0x728] ss:$16 sps:$4 sm:$0xff]  }
 0x1b0   :  { %2090 = vmatpush1.bf16.msra.mxu0 %v3355_v27  ;;  %2262 = vmatpush1.bf16.msra.mxu1 %v3358_v28  ;;  %v3447_v27 = vld [vmem:[#allocation8 + $0x744] ss:$16 sps:$4 sm:$0xff]   ;;  %v3450_v28 = vld [vmem:[#allocation8 + $0x74c] ss:$16 sps:$4 sm:$0xff]  }
 0x1b1   :  { %2091 = vmatprep.subr.bf16.mxu0 %v3363_v29  ;;  %2263 = vmatprep.subr.bf16.mxu1 %v3366_v30  ;;  %v3445_v29 = vld [vmem:[#allocation8 + $0x740] ss:$16 sps:$4 sm:$0xff]   ;;  %v3448_v30 = vld [vmem:[#allocation8 + $0x748] ss:$16 sps:$4 sm:$0xff]  }
 0x1b4   :  { %2092 = vmatpush1.bf16.msra.mxu0 %v3361_v31  ;;  %2264 = vmatpush1.bf16.msra.mxu1 %v3364_v32  ;;  %v3453_v31 = vld [vmem:[#allocation8 + $0x764] ss:$16 sps:$4 sm:$0xff]   ;;  %v3456_v32 = vld [vmem:[#allocation8 + $0x76c] ss:$16 sps:$4 sm:$0xff]  }
 0x1b5   :  { %2093 = vmatprep.subr.bf16.mxu0 %v3369_v33  ;;  %2265 = vmatprep.subr.bf16.mxu1 %v3372_v34  ;;  %v3451_v33 = vld [vmem:[#allocation8 + $0x760] ss:$16 sps:$4 sm:$0xff]   ;;  %v3454_v34 = vld [vmem:[#allocation8 + $0x768] ss:$16 sps:$4 sm:$0xff]  }
 0x1b8   :  { %2094 = vmatpush1.bf16.msra.mxu0 %v3367_v35  ;;  %2266 = vmatpush1.bf16.msra.mxu1 %v3370_v36  ;;  %v3459_v35 = vld [vmem:[#allocation8 + $0x784] ss:$16 sps:$4 sm:$0xff]   ;;  %v3462_v36 = vld [vmem:[#allocation8 + $0x78c] ss:$16 sps:$4 sm:$0xff]  }
 0x1b9   :  { %2095 = vmatprep.subr.bf16.mxu0 %v3375_v43  ;;  %2267 = vmatprep.subr.bf16.mxu1 %v3378_v44  ;;  %v3457_v43 = vld [vmem:[#allocation8 + $0x780] ss:$16 sps:$4 sm:$0xff]   ;;  %v3460_v44 = vld [vmem:[#allocation8 + $0x788] ss:$16 sps:$4 sm:$0xff]  }
 0x1bc   :  { %2096 = vmatpush1.bf16.msra.mxu0 %v3373_v45  ;;  %2268 = vmatpush1.bf16.msra.mxu1 %v3376_v46  ;;  %v3465_v45 = vld [vmem:[#allocation8 + $0x7a4] ss:$16 sps:$4 sm:$0xff]   ;;  %v3468_v46 = vld [vmem:[#allocation8 + $0x7ac] ss:$16 sps:$4 sm:$0xff]  }
 0x1bd   :  { %2097 = vmatprep.subr.bf16.mxu0 %v3381_v47  ;;  %2269 = vmatprep.subr.bf16.mxu1 %v3384_v48  ;;  %v3463_v47 = vld [vmem:[#allocation8 + $0x7a0] ss:$16 sps:$4 sm:$0xff]   ;;  %v3466_v48 = vld [vmem:[#allocation8 + $0x7a8] ss:$16 sps:$4 sm:$0xff]  }
 0x1c0   :  { %2098 = vmatpush1.bf16.msra.mxu0 %v3379_v49  ;;  %2270 = vmatpush1.bf16.msra.mxu1 %v3382_v50  ;;  %v3471_v49 = vld [vmem:[#allocation8 + $0x7c4] ss:$16 sps:$4 sm:$0xff]   ;;  %v3474_v50 = vld [vmem:[#allocation8 + $0x7cc] ss:$16 sps:$4 sm:$0xff]  }
 0x1c1   :  { %2110 = vmatprep.subr.bf16.mxu0 %v3387_v51  ;;  %2282 = vmatprep.subr.bf16.mxu1 %v3390_v52  ;;  %v3469_v51 = vld [vmem:[#allocation8 + $0x7c0] ss:$16 sps:$4 sm:$0xff]   ;;  %v3472_v52 = vld [vmem:[#allocation8 + $0x7c8] ss:$16 sps:$4 sm:$0xff]  }
 0x1c3   :  { %2100 = vmatmul.mubr.bf16.vlgmr.msra.gmra.mrb[8].mxu0 %v3804_v23  ;;  %2272 = vmatmul.mubr.bf16.vlgmr.msra.gmra.mrb[8].mxu1 %v3804_v23  ;;  %v3408_v23 = vld [vmem:[#allocation8 + $0x66c] ss:$16 sps:$4 sm:$0xff]  }
 0x1c4   :  { %2111 = vmatpush1.bf16.msra.mxu0 %v3385_v53  ;;  %2283 = vmatpush1.bf16.msra.mxu1 %v3388_v54  ;;  %v3477_v53 = vld [vmem:[#allocation8 + $0x7e4] ss:$16 sps:$4 sm:$0xff]   ;;  %v3480_v54 = vld [vmem:[#allocation8 + $0x7ec] ss:$16 sps:$4 sm:$0xff]  }
 0x1c5   :  { %2112 = vmatprep.subr.bf16.mxu0 %v3393_v55  ;;  %2284 = vmatprep.subr.bf16.mxu1 %v3396_v9  ;;  %v3475_v55 = vld [vmem:[#allocation8 + $0x7e0] ss:$16 sps:$4 sm:$0xff]   ;;  %v3478_v9 = vld [vmem:[#allocation8 + $0x7e8] ss:$16 sps:$4 sm:$0xff]  }
 0x1c6   :  { %2142 = vmatprep.mubr.bf16.mxu0 %v3814_v0  ;;  %2314 = vmatprep.mubr.bf16.mxu1 %v3814_v0  ;;  %v3412_v0 = vld [vmem:[#allocation8 + $0x688] ss:$16 sps:$4 sm:$0xff]  }
 0x1c8   :  { %2113 = vmatpush1.bf16.msra.mxu0 %v3391_v56  ;;  %2285 = vmatpush1.bf16.msra.mxu1 %v3394_v57  ;;  %v3481_v56 = vld [vmem:[#allocation10 + $0x40] sm:$0xff]  }
 0x1c9   :  { %2114 = vmatprep.subr.bf16.mxu0 %v3399_v58  ;;  %2286 = vmatprep.subr.bf16.mxu1 %v3402_v59  ;;  %v3482_v57 = vld [vmem:[#allocation10 + $0xc0] sm:$0xff]  }
 0x1ca   :  { %v3483_v58 = vld [vmem:[#allocation10] sm:$0xff]  }
 0x1cb   :  { %v3484_v59 = vld [vmem:[#allocation10 + $0x80] sm:$0xff]  }
 0x1cc   :  { %2115 = vmatpush1.bf16.msra.mxu0 %v3397_v60  ;;  %2287 = vmatpush1.bf16.msra.mxu1 %v3400_v26  ;;  %v3485_v60 = vld [vmem:[#allocation10 + $0x48] sm:$0xff]  }
 0x1cd   :  { %2116 = vmatprep.subr.bf16.mxu0 %v3405_v61  ;;  %2288 = vmatprep.subr.bf16.mxu1 %v3408_v23  ;;  %v3486_v26 = vld [vmem:[#allocation10 + $0xc8] sm:$0xff]  }
 0x1ce   :  { %v3487_v61 = vld [vmem:[#allocation10 + $0x8] sm:$0xff]  }
 0x1cf   :  { %v3488_v23 = vld [vmem:[#allocation10 + $0x88] sm:$0xff]  }
 0x1d0   :  { %2117 = vmatpush1.bf16.msra.mxu0 %v3403_v62  ;;  %2289 = vmatpush1.bf16.msra.mxu1 %v3406_v40  ;;  %v3489_v62 = vld [vmem:[#allocation10 + $0x50] sm:$0xff]  }
 0x1d1   :  { %2118 = vmatprep.subr.bf16.mxu0 %v3411_v1  ;;  %2290 = vmatprep.subr.bf16.mxu1 %v3414_v2  ;;  %v3490_v40 = vld [vmem:[#allocation10 + $0xd0] sm:$0xff]  }
 0x1d2   :  { %v3491_v1 = vld [vmem:[#allocation10 + $0x10] sm:$0xff]  }
 0x1d3   :  { %v3492_v2 = vld [vmem:[#allocation10 + $0x90] sm:$0xff]  }
 0x1d4   :  { %2119 = vmatpush1.bf16.msra.mxu0 %v3409_v3  ;;  %2291 = vmatpush1.bf16.msra.mxu1 %v3412_v0  ;;  %v3493_v3 = vld [vmem:[#allocation10 + $0x58] sm:$0xff]  }
 0x1d5   :  { %2120 = vmatprep.subr.bf16.mxu0 %v3417_v4  ;;  %2292 = vmatprep.subr.bf16.mxu1 %v3420_v5  ;;  %v3494_v0 = vld [vmem:[#allocation10 + $0xd8] sm:$0xff]   ;;  %v3497_v5 = vld [vmem:[#allocation10 + $0x60] sm:$0xff]  }
 0x1d6   :  { %v3495_v4 = vld [vmem:[#allocation10 + $0x18] sm:$0xff]  }
 0x1d8   :  { %2121 = vmatpush1.bf16.msra.mxu0 %v3415_v6  ;;  %2293 = vmatpush1.bf16.msra.mxu1 %v3418_v7  ;;  %v3498_v6 = vld [vmem:[#allocation10 + $0xe0] sm:$0xff]  }
 0x1d9   :  { %2122 = vmatprep.subr.bf16.mxu0 %v3423_v8  ;;  %2294 = vmatprep.subr.bf16.mxu1 %v3426_v10  ;;  %v3499_v7 = vld [vmem:[#allocation10 + $0x20] sm:$0xff]   ;;  %v3501_v10 = vld [vmem:[#allocation10 + $0x68] sm:$0xff]  }
 0x1da   :  { %v3500_v8 = vld [vmem:[#allocation10 + $0xa0] sm:$0xff]  }
 0x1dc   :  { %2123 = vmatpush1.bf16.msra.mxu0 %v3421_v11  ;;  %2295 = vmatpush1.bf16.msra.mxu1 %v3424_v12  ;;  %v3502_v11 = vld [vmem:[#allocation10 + $0xe8] sm:$0xff]  }
 0x1dd   :  { %2124 = vmatprep.subr.bf16.mxu0 %v3429_v13  ;;  %2296 = vmatprep.subr.bf16.mxu1 %v3432_v14  ;;  %v3503_v12 = vld [vmem:[#allocation10 + $0x28] sm:$0xff]   ;;  %v3505_v14 = vld [vmem:[#allocation10 + $0x70] sm:$0xff]  }
 0x1de   :  { %v3504_v13 = vld [vmem:[#allocation10 + $0xa8] sm:$0xff]  }
 0x1e0   :  { %2125 = vmatpush1.bf16.msra.mxu0 %v3427_v15  ;;  %2297 = vmatpush1.bf16.msra.mxu1 %v3430_v16  ;;  %v3506_v15 = vld [vmem:[#allocation10 + $0xf0] sm:$0xff]  }
 0x1e1   :  { %2126 = vmatprep.subr.bf16.mxu0 %v3435_v17  ;;  %2298 = vmatprep.subr.bf16.mxu1 %v3438_v18  ;;  %v3507_v16 = vld [vmem:[#allocation10 + $0x30] sm:$0xff]   ;;  %v3509_v18 = vld [vmem:[#allocation10 + $0x78] sm:$0xff]  }
 0x1e2   :  { %v3508_v17 = vld [vmem:[#allocation10 + $0xb0] sm:$0xff]  }
 0x1e4   :  { %2127 = vmatpush1.bf16.msra.mxu0 %v3433_v19  ;;  %2299 = vmatpush1.bf16.msra.mxu1 %v3436_v20  ;;  %v3510_v19 = vld [vmem:[#allocation10 + $0xf8] sm:$0xff]  }
 0x1e5   :  { %2128 = vmatprep.subr.bf16.mxu0 %v3441_v21  ;;  %2300 = vmatprep.subr.bf16.mxu1 %v3444_v22  ;;  %v3511_v20 = vld [vmem:[#allocation10 + $0x38] sm:$0xff]   ;;  %v679_v22 = vld [vmem:[%s3856_s4] sm:$0xf] }
 0x1e6   :  { %v3512_v21 = vld [vmem:[#allocation10 + $0xb8] sm:$0xff]  }
 0x1e8   :  { %2129 = vmatpush1.bf16.msra.mxu0 %v3439_v24  ;;  %2301 = vmatpush1.bf16.msra.mxu1 %v3442_v25  ;;  %v684_v24 = vrot.slane %v679_v22, %v116_v38  ;;  %v692_v25 = vrot.slane %v679_v22, %v124_v39 }
 0x1e9   :  { %2130 = vmatprep.subr.bf16.mxu0 %v3447_v27  ;;  %2302 = vmatprep.subr.bf16.mxu1 %v3450_v28 }
 0x1ec   :  { %2131 = vmatpush1.bf16.msra.mxu0 %v3445_v29  ;;  %2303 = vmatpush1.bf16.msra.mxu1 %v3448_v30  ;;  %v688_v29 = vrot.slane %v679_v22, %v120_v41  ;;  %v696_v30 = vrot.slane %v679_v22, %v128_v42 }
 0x1ed   :  { %2132 = vmatprep.subr.bf16.mxu0 %v3453_v31  ;;  %2304 = vmatprep.subr.bf16.mxu1 %v3456_v32 }
 0x1f0   :  { %2133 = vmatpush1.bf16.msra.mxu0 %v3451_v33  ;;  %2305 = vmatpush1.bf16.msra.mxu1 %v3454_v34 }
 0x1f1   :  { %2134 = vmatprep.subr.bf16.mxu0 %v3459_v35  ;;  %2306 = vmatprep.subr.bf16.mxu1 %v3462_v36 }
 0x1f4   :  { %2135 = vmatpush1.bf16.msra.mxu0 %v3457_v43  ;;  %2307 = vmatpush1.bf16.msra.mxu1 %v3460_v44 }
 0x1f5   :  { %2136 = vmatprep.subr.bf16.mxu0 %v3465_v45  ;;  %2308 = vmatprep.subr.bf16.mxu1 %v3468_v46 }
 0x1f8   :  { %2137 = vmatpush1.bf16.msra.mxu0 %v3463_v47  ;;  %2309 = vmatpush1.bf16.msra.mxu1 %v3466_v48 }
 0x1f9   :  { %2138 = vmatprep.subr.bf16.mxu0 %v3471_v49  ;;  %2310 = vmatprep.subr.bf16.mxu1 %v3474_v50 }
 0x1fc   :  { %2139 = vmatpush1.bf16.msra.mxu0 %v3469_v51  ;;  %2311 = vmatpush1.bf16.msra.mxu1 %v3472_v52  ;;  %v2972_v52 = vld [vmem:[%s3858_s6] ss:$0 sm:$0xff]  ;;  %s3623_s6 = scalar_lea.vmem %s2682_s18, 256 }
 0x1fd   :  { %2140 = vmatprep.subr.bf16.mxu0 %v3477_v53  ;;  %2312 = vmatprep.subr.bf16.mxu1 %v3480_v54  ;;  %p3624_p12 = scmp.ne.s32.totalorder %s2682_s18, %s3623_s6  ;;  %p3629_p0 = scmp.lt.s32.totalorder %s3623_s6, %s3623_s6 }
 0x1ff   :  { %p3630_p1 = por %p3629_p0, %p3628_p13 }
 0x200   :  { %2141 = vmatpush1.bf16.msra.mxu0 %v3475_v55  ;;  %2313 = vmatpush1.bf16.msra.mxu1 %v3478_v9 }
 0x201   :  { %3005 = vmatprep.subr.bf16.mxu0 %v3481_v56  ;;  %3027 = vmatprep.subr.bf16.mxu1 %v3482_v57  ;;  %p3631_p2 = pnand %p3630_p1, %p3624_p12 }
 0x203   :  { %2143 = vmatmul.mubr.bf16.vlgmr.msra.gmra.mrb[8].mxu0 %v3812_v63  ;;  %2315 = vmatmul.mubr.bf16.vlgmr.msra.gmra.mrb[8].mxu1 %v3812_v63  ;;  %v3496_v63 = vld [vmem:[#allocation10 + $0x98] sm:$0xff]  }
 0x204   :  { %3006 = vmatpush3.bf16.msra.mxu0 %v3483_v58  ;;  %3028 = vmatpush3.bf16.msra.mxu1 %v3484_v59 }
 0x205   :  { %3007 = vmatprep.subr.bf16.mxu0 %v3485_v60  ;;  %3029 = vmatprep.subr.bf16.mxu1 %v3486_v26 }
 0x208   :  { %3008 = vmatpush3.bf16.msra.mxu0 %v3487_v61  ;;  %3030 = vmatpush3.bf16.msra.mxu1 %v3488_v23 }
 0x209   :  { %3009 = vmatprep.subr.bf16.mxu0 %v3489_v62  ;;  %3031 = vmatprep.subr.bf16.mxu1 %v3490_v40 }
 0x20c   :  { %3010 = vmatpush3.bf16.msra.mxu0 %v3491_v1  ;;  %3032 = vmatpush3.bf16.msra.mxu1 %v3492_v2 }
 0x20d   :  { %3011 = vmatprep.subr.bf16.mxu0 %v3493_v3  ;;  %3033 = vmatprep.subr.bf16.mxu1 %v3494_v0 }
 0x210   :  { %3012 = vmatpush3.bf16.msra.mxu0 %v3495_v4  ;;  %3034 = vmatpush3.bf16.msra.mxu1 %v3496_v63 }
 0x211   :  { %3013 = vmatprep.subr.bf16.mxu0 %v3497_v5  ;;  %3035 = vmatprep.subr.bf16.mxu1 %v3498_v6 }
 0x214   :  { %3014 = vmatpush3.bf16.msra.mxu0 %v3499_v7  ;;  %3036 = vmatpush3.bf16.msra.mxu1 %v3500_v8 }
 0x215   :  { %3015 = vmatprep.subr.bf16.mxu0 %v3501_v10  ;;  %3037 = vmatprep.subr.bf16.mxu1 %v3502_v11 }
 0x218   :  { %3016 = vmatpush3.bf16.msra.mxu0 %v3503_v12  ;;  %3038 = vmatpush3.bf16.msra.mxu1 %v3504_v13 }
 0x219   :  { %3017 = vmatprep.subr.bf16.mxu0 %v3505_v14  ;;  %3039 = vmatprep.subr.bf16.mxu1 %v3506_v15 }
 0x21c   :  { %3018 = vmatpush3.bf16.msra.mxu0 %v3507_v16  ;;  %3040 = vmatpush3.bf16.msra.mxu1 %v3508_v17 }
 0x21d   :  { %3019 = vmatprep.subr.bf16.mxu0 %v3509_v18  ;;  %3041 = vmatprep.subr.bf16.mxu1 %v3510_v19 }
 0x220   :  { %3020 = vmatpush3.bf16.msra.mxu0 %v3511_v20  ;;  %3042 = vmatpush3.bf16.msra.mxu1 %v3512_v21 }
 0x2d6   :  { %v2144_v27 = vpop.f32.mrb[8].mxu0  ;;  %v2316_v28 = vpop.f32.mrb[8].mxu1 }
 0x2d7   :  { %v2146_v31 = vpop.f32.mrb[9].mxu0  ;;  %v2318_v32 = vpop.f32.mrb[9].mxu1  ;;  %v3049_v35 = vadd.f32 %v2144_v27, %v684_v24  ;;  %v3053_v36 = vadd.f32 %v2316_v28, %v692_v25 }
 0x2d8   :  { %v2148_v33 = vpop.f32.mrb[10].mxu0  ;;  %v2320_v34 = vpop.f32.mrb[10].mxu1  ;;  %v3050_v46 = vadd.f32 %v2146_v31, %v688_v29  ;;  %v3054_v39 = vadd.f32 %v2318_v32, %v696_v30 }
 0x2d9   :  { %v3051_v43 = vadd.f32 %v2148_v33, %v684_v24  ;;  %v3055_v44 = vadd.f32 %v2320_v34, %v692_v25  ;;  %v2150_v38 = vpop.f32.mrb[11].mxu0  ;;  %v2322_v45 = vpop.f32.mrb[11].mxu1 }
 0x2da   :  { %v3052_v47 = vadd.f32 %v2150_v38, %v688_v29  ;;  %v3056_v48 = vadd.f32 %v2322_v45, %v696_v30 }
 0x2db   :  { %v2325_v49 = vpack.c.bf16 %v3051_v43, %v3049_v35  ;;  %v2327_v50 = vpack.c.bf16 %v3055_v44, %v3053_v36 }
 0x2dc   :  { %v2326_v41 = vpack.c.bf16 %v3052_v47, %v3050_v46  ;;  %v2328_v51 = vpack.c.bf16 %v3056_v48, %v3054_v39 }
 0x2de   :  { %2624 = vmatprep.mubr.bf16.mxu0 %v2326_v41  ;;  %2665 = vmatprep.mubr.bf16.mxu1 %v2328_v51 }
 0x2df   :  { %2625 = vmatmul.mubr.bf16.vlgmr.msra.gmra.mrb[12].mxu0 %v2325_v49  ;;  %2666 = vmatmul.mubr.bf16.vlgmr.msra.gmra.mrb[12].mxu1 %v2327_v50 }
 0x3b2   :  { %v3021_v37 = vpop.f32.mrb[12].mxu0  ;;  %v3043_v42 = vpop.f32.mrb[12].mxu1 }
 0x3b3   :  { %v3022_v53 = vpop.f32.mrb[13].mxu0  ;;  %v3044_v54 = vpop.f32.mrb[13].mxu1 }
 0x3b4   :  { %v3023_v55 = vadd.f32 %v3022_v53, %v3021_v37  ;;  %v3045_v9 = vadd.f32 %v3044_v54, %v3043_v42  ;;  %v3024_v56 = vpop.f32.mrb[14].mxu0  ;;  %v3046_v57 = vpop.f32.mrb[14].mxu1 }
 0x3b5   :  { %v3025_v58 = vpop.f32.mrb[15].mxu0  ;;  %v3047_v59 = vpop.f32.mrb[15].mxu1 }
 0x3b6   :  { %v2627_v60 = vadd.f32 %v3023_v55, %v2972_v52  ;;  %v3026_v26 = vadd.f32 %v3025_v58, %v3024_v56  ;;  %v3048_v61 = vadd.f32 %v3047_v59, %v3046_v57 }
 0x3b8   :  { %v2668_v23 = vadd.f32 %v3045_v9, %v2627_v60  ;;  %v2630_v62 = vadd.f32 %v3026_v26, %v2972_v52 }
 0x3ba   :  { %2674 = vst [vmem:[#allocation11] sm:$0xff] %v2668_v23  ;;  %v2671_v40 = vadd.f32 %v3048_v61, %v2630_v62 }
 0x3bc   :  { %2675 = vst [vmem:[#allocation11 + $0x8] sm:$0xff] %v2671_v40 }
 0x3bd   :  { %3634 = shalt.err (!%p3631_p2)
}
 0x3be   :  { %s3635_s21 = scalar_lea.hbm %s3859_s7, 256 }
 0x3bf   :  { %p3636_p3 = scmp.ne.s32.totalorder %s3859_s7, %s3635_s21  ;;  %p3639_p4 = scmp.lt.u32.totalorder %s3635_s21, %s3859_s7 }
 0x3c1   :  { %p3641_p5 = pnand %p3639_p4, %p3636_p3 }
 0x3c3   :  { %3644 = shalt.err (!%p3641_p5)
}
 0x3c4   :  { %s3666_s25 = smov 128   ;;  %s3667_s26 = smov 8  }
 0x3c5   :  { %2687 = dma.vmem_to_hbm [thread:$0]  %s2682_s18, 256, %s3859_s7, [#allocation4], %s3666_s25, %s3666_s25, %s3667_s26  }
 0x3c6   :  { %3651 = dma.done.wait [#allocation4], 256  }
 0x3c7   :  { %3652 = vsyncadd [#allocation4], 4294967040 }
 0x3c8   :  { %2691 = vsyncpa [#allocation3], 1 }
 0x3c9   :  { %2692 = vsyncpa [#allocation6], 1 }
 0x3ca   :  { %2693 = vsyncpa [#allocation9], 1 }
 0x3cb   :  { %2694 = vsyncpa [#allocation4], 1 }

</bundles_post_ra>
